<compile_context>
chip_gen: v7x
topology: tpu7x:2x2x1
jax: 0.10.0
libtpu: 0.0.40
codegen_flags: <defaults>
</compile_context>

<pallas_src>
import functools

import jax
import jax.numpy as jnp
from jax.experimental import pallas as pl
from jax.experimental.pallas import tpu as pltpu


# ---------------------------------------------------------------------------
# Kernel 1: feature transform   Y_b = X @ V_b  (b < G),   H_self = X @ W_loop
# ---------------------------------------------------------------------------
def _feat_transform_kernel(x_ref, w_ref, y_ref, hself_ref):
    """x_ref : (tn, in)              compute dtype
    w_ref : (in, (G+1)*out)          compute dtype; cols [g*out:(g+1)*out] = V_g,
                                     last column block = loop_weight
    y_ref : (G, tn, out)             compute dtype
    hself_ref : (tn, out)            f32 (seeds the f32 accumulator in kernel 2)
    """
    g_dim = y_ref.shape[0]
    out_feat = hself_ref.shape[-1]
    # One wide matmul (N = (G+1)*out) instead of G+1 separate K=128/N=128
    # matmuls -> better MXU fill on the 256-wide v6e/v7x array.
    res = jnp.dot(x_ref[...], w_ref[...], preferred_element_type=jnp.float32)
    for g in range(g_dim):
        y_ref[g] = res[:, g * out_feat:(g + 1) * out_feat].astype(y_ref.dtype)
    hself_ref[...] = res[:, g_dim * out_feat:]


# ---------------------------------------------------------------------------
# Kernel 2: aggregation   h = relu( sum_b A_b @ Y_b + H_self + bias )
# ---------------------------------------------------------------------------
def _rgcn_agg_kernel(adj_ref, y_ref, hself_ref, bias_ref, out_ref, acc_ref):
    """Grid = (dst_tiles ["parallel"], src_tiles ["arbitrary", LAST]).

    adj_ref  : (G, tm, tk)   basis-folded normalized adjacency block, compute dtype
    y_ref    : (G, tk, out)  pre-transformed src features X @ V_b, compute dtype
    hself_ref: (tm, out)     self-loop term X_dst @ loop_weight, f32
    bias_ref : (1, out)      f32
    out_ref  : (tm, out)
    acc_ref  : (tm, out)     f32 VMEM scratch (partial sums across src chunks)
    """
    k = pl.program_id(1)

    @pl.when(k == 0)
    def _init():
        # Self-loop term initializes the f32 accumulator.
        acc_ref[...] = hself_ref[...]

    g_dim = adj_ref.shape[0]
    # K = tk (src tile) per matmul -> deep MXU fill; f32 accumulation.
    upd = jnp.dot(adj_ref[0], y_ref[0], preferred_element_type=jnp.float32)
    for g in range(1, g_dim):
        upd = upd + jnp.dot(adj_ref[g], y_ref[g],
                            preferred_element_type=jnp.float32)
    acc_ref[...] += upd

    @pl.when(k == pl.num_programs(1) - 1)
    def _epilogue():
        # bias + ReLU in f32 (dropout p=0.0 is identity); one cast to out dtype.
        out_ref[...] = jnp.maximum(acc_ref[...] + bias_ref[...], 0.0
                                   ).astype(out_ref.dtype)


# ---------------------------------------------------------------------------
# Host-side helpers
# ---------------------------------------------------------------------------
def fold_basis_adjacency(adj_norm, coeff, *, compute_dtype=jnp.bfloat16):
    """Exact linear identity (valid because GraphConv here has no per-relation
    bias/activation, HeteroGraphConv aggregation is 'sum', dropout follows
    aggregation):

        sum_r (A_r @ X) @ W_r,  W_r = sum_b coeff[r,b] V_b
      = sum_b A_b @ (X @ V_b),  A_b = sum_r coeff[r,b] A_r

    Emits A_b ALREADY in the kernel compute dtype so the dominant O(G*N^2)
    tensor is cast once and persisted (no per-call cast / extra HBM round trip).
    """
    num_rels, num_bases = coeff.shape
    assert adj_norm.shape[0] == num_rels and num_bases <= num_rels
    adj_b = jnp.einsum("rb,rds->bds", coeff, adj_norm,
                       precision=jax.lax.Precision.HIGHEST)
    return adj_b.astype(compute_dtype)


@functools.partial(jax.jit,
                   static_argnames=("tm", "tk", "tn", "compute_dtype"))
def rgcn_forward(adj_b, x, basis_v, loop_weight, h_bias, *,
                 tm=None, tk=None, tn=None, compute_dtype=jnp.bfloat16):
    """adj_b      : [G, N_dst, N_src] basis-folded normalized adjacency,
                    already in `compute_dtype` (see fold_basis_adjacency)
    x           : [N, in_feat] f32 node features (single node type)
    basis_v     : [G, in_feat, out_feat] f32 basis weights V_b
    loop_weight : [in_feat, out_feat] f32
    h_bias      : [out_feat] f32
    """
    G, N_dst, N_src = adj_b.shape
    N, in_feat = x.shape
    out_feat = basis_v.shape[2]
    assert N == N_src == N_dst, "homogeneous graph assumed (see TODO at top)"
    assert basis_v.shape == (G, in_feat, out_feat)
    assert loop_weight.shape == (in_feat, out_feat)
    assert adj_b.dtype == jnp.dtype(compute_dtype), (
        "fold_basis_adjacency must emit the adjacency in the compute dtype "
        "(avoid re-casting the O(G*N^2) tensor on every call)")

    cd = jnp.dtype(compute_dtype)
    out_dtype = x.dtype

    # ---- tile defaults ----------------------------------------------------
    if tm is None:                        # destination-node tile
        tm = min(N_dst, 256)
        # v7x megacore: ensure >= 2 dst tiles when possible.
        if N_dst == tm and tm % 16 == 0:
            tm //= 2
    if tk is None:                        # source (reduction) tile
        # <= 2048 keeps double-buffered (G,tm,tk) + (G,tk,out) blocks well
        # inside v7x's 64 MiB VMEM; v6e/v5e callers may pass larger/smaller tk.
        tk = min(N_src, 2048)
    if tn is None:                        # node tile for the feature transform
        tn = min(N_src, 256)
    assert N_dst % tm == 0 and N_src % tk == 0 and N_src % tn == 0
    assert tm % 8 == 0 and (tk % 128 == 0 or tk == N_src)

    # ---- kernel 1: Y_b = X @ V_b, H_self = X @ loop_weight -----------------
    w_stack = jnp.concatenate([basis_v, loop_weight[None]], axis=0)  # (G+1,in,out)
    w_all = jnp.transpose(w_stack, (1, 0, 2)).reshape(
        in_feat, (G + 1) * out_feat)

    y, h_self = pl.pallas_call(
        _feat_transform_kernel,
        out_shape=(jax.ShapeDtypeStruct((G, N_src, out_feat), cd),
                   jax.ShapeDtypeStruct((N_dst, out_feat), jnp.float32)),
        grid_spec=pltpu.PrefetchScalarGridSpec(
            num_scalar_prefetch=0,
            grid=(N_src // tn,),
            in_specs=[
                pl.BlockSpec((tn, in_feat), lambda i: (i, 0)),
                pl.BlockSpec((in_feat, (G + 1) * out_feat), lambda i: (0, 0)),
            ],
            out_specs=(
                pl.BlockSpec((G, tn, out_feat), lambda i: (0, i, 0)),
                pl.BlockSpec((tn, out_feat), lambda i: (i, 0)),
            ),
        ),
        compiler_params=pltpu.CompilerParams(
            dimension_semantics=("parallel",)),
    )(x.astype(cd), w_all.astype(cd))

    # ---- kernel 2: src-tiled aggregation + fused epilogue -------------------
    bias2d = h_bias.reshape(1, out_feat).astype(jnp.float32)

    # Explicit VMEM budget from the actual block sizes (double-buffered inputs
    # + resident output + f32 accumulator), with 25% headroom.
    blk_bytes = (G * tm * tk * cd.itemsize            # adjacency block
                 + G * tk * out_feat * cd.itemsize    # Y block
                 + tm * out_feat * 4                  # self-loop block (f32)
                 + 8 * out_feat * 4                   # bias (sublane-padded)
                 + tm * out_feat * out_dtype.itemsize)
    vmem_limit = max(int(2 * blk_bytes * 1.25) + tm * out_feat * 4, 16 * 2**20)

    out = pl.pallas_call(
        _rgcn_agg_kernel,
        out_shape=jax.ShapeDtypeStruct((N_dst, out_feat), out_dtype),
        grid_spec=pltpu.PrefetchScalarGridSpec(
            num_scalar_prefetch=0,
            grid=(N_dst // tm, N_src // tk),          # reduction axis LAST
            in_specs=[
                pl.BlockSpec((G, tm, tk), lambda i, k: (0, i, k)),       # adjacency
                pl.BlockSpec((G, tk, out_feat), lambda i, k: (0, k, 0)),  # Y chunk
                pl.BlockSpec((tm, out_feat), lambda i, k: (i, 0)),        # self-loop
                pl.BlockSpec((1, out_feat), lambda i, k: (0, 0)),         # bias
            ],
            out_specs=pl.BlockSpec((tm, out_feat), lambda i, k: (i, 0)),
            scratch_shapes=[pltpu.VMEM((tm, out_feat), jnp.float32)],
        ),
        compiler_params=pltpu.CompilerParams(
            dimension_semantics=("parallel", "arbitrary"),
            vmem_limit_bytes=vmem_limit),
    )(adj_b, y, h_self, bias2d)
    return out


# ---------------------------------------------------------------------------
# Reference + demo
# ---------------------------------------------------------------------------
def _xavier_uniform(key, shape, gain):
    # nn.init.xavier_uniform_ on the last two dims (fan_in, fan_out)
    fan_in, fan_out = shape[-2], shape[-1]
    bound = gain * (6.0 / (fan_in + fan_out)) ** 0.5
    return jax.random.uniform(key, shape, jnp.float32, -bound, bound)


def _reference_module(adj_norm, x, rel_weight, loop_weight, h_bias):
    """Plain-JAX forward matching the PyTorch module semantics (f32)."""
    hi = jax.lax.Precision.HIGHEST
    h = jnp.einsum("rds,sf->rdf", adj_norm, x, precision=hi)
    h = jnp.einsum("rdf,rfo->do", h, rel_weight, precision=hi)
    h = h + jnp.dot(x, loop_weight, precision=hi) + h_bias[None, :]
    return jnp.maximum(h, 0.0)


if __name__ == "__main__":
    key = jax.random.PRNGKey(0)
    k_adj, k_x, k_basis, k_coef, k_loop = jax.random.split(key, 5)

    # module config
    rel_names = ["writes", "cites", "follows"]   # 3 relations
    num_rels = len(rel_names)
    num_bases = 2                                # num_bases < num_rels -> WeightBasis
    in_feat, out_feat = 128, 128
    N = 512                                      # nodes (single node type)
    gain = 2.0 ** 0.5                            # calculate_gain('relu')

    # ---- deterministic parameters (mirrors __init__) ----
    basis_v = _xavier_uniform(k_basis, (num_bases, in_feat, out_feat), gain)
    coeff = _xavier_uniform(k_coef, (num_rels, num_bases), gain)
    rel_weight = jnp.einsum("rb,bio->rio", coeff, basis_v)   # W_r = sum_b c_rb V_b
    loop_weight = _xavier_uniform(k_loop, (in_feat, out_feat), gain)
    h_bias = jnp.zeros((out_feat,), jnp.float32)

    # ---- synthetic graph + features ----
    adj = (jax.random.uniform(k_adj, (num_rels, N, N)) < 0.3).astype(jnp.float32)
    in_deg = jnp.clip(adj.sum(axis=2, keepdims=True), 1.0, None)  # clamp(min=1)
    adj_norm = adj / in_deg                                       # 'right' norm
    x = jax.random.normal(k_x, (N, in_feat), jnp.float32)

    ref = _reference_module(adj_norm, x, rel_weight, loop_weight, h_bias)

    # f32 MXU path, small tiles to exercise both grid axes (4 dst x 4 src steps).
    adj_b_f32 = fold_basis_adjacency(adj_norm, coeff, compute_dtype=jnp.float32)
    out_f32 = jax.block_until_ready(
        rgcn_forward(adj_b_f32, x, basis_v, loop_weight, h_bias,
                     tm=128, tk=128, compute_dtype=jnp.float32))
    assert out_f32.shape == (N, out_feat)
    assert jnp.allclose(out_f32, ref, atol=1e-3, rtol=1e-3), (
        float(jnp.max(jnp.abs(out_f32 - ref))))

    # bf16 MXU path with the default tile selection; the bf16 adjacency is
    # produced once by fold_basis_adjacency and reused (no per-call cast).
    adj_b_bf16 = fold_basis_adjacency(adj_norm, coeff, compute_dtype=jnp.bfloat16)
    out_bf16 = jax.block_until_ready(
        rgcn_forward(adj_b_bf16, x, basis_v, loop_weight, h_bias,
                     compute_dtype=jnp.bfloat16))
    assert out_bf16.shape == (N, out_feat)
    assert jnp.allclose(out_bf16, ref, atol=1e-1, rtol=1e-1), (
        float(jnp.max(jnp.abs(out_bf16 - ref))))

    print("KERNEL_OK")
</pallas_src>

<mosaic_0001>
module attributes {stable_mosaic.version = 11 : i64} {
  func.func @_rgcn_agg_kernel(%arg0: i32, %arg1: i32, %arg2: memref<2x128x128xf32, #tpu.memory_space<vmem>>, %arg3: memref<2x128x128xf32, #tpu.memory_space<vmem>>, %arg4: memref<128x128xf32, #tpu.memory_space<vmem>>, %arg5: memref<1x128xf32, #tpu.memory_space<vmem>>, %arg6: memref<128x128xf32, #tpu.memory_space<vmem>>, %arg7: memref<128x128xf32, #tpu.memory_space<vmem>>) attributes {dimension_semantics = [#tpu.dimension_semantics<parallel>, #tpu.dimension_semantics<arbitrary>], iteration_bounds = array<i64: 4, 4>, scalar_prefetch = 0 : i64, scratch_operands = 1 : i64, tpu.core_type = #tpu.core_type<tc>, window_params = [{transform_indices = @transform_0, window_bounds = array<i64: 2, 128, 128>}, {transform_indices = @transform_1, window_bounds = array<i64: 2, 128, 128>}, {transform_indices = @transform_2, window_bounds = array<i64: 128, 128>}, {pipeline_mode = #tpu.pipeline_mode<synchronous>, transform_indices = @transform_3, window_bounds = array<i64: 1, 128>}, {transform_indices = @transform_4, window_bounds = array<i64: 128, 128>}]} {
    %c0_i32 = arith.constant 0 : i32
    %0 = arith.cmpi eq, %arg1, %c0_i32 : i32
    %1 = arith.extui %0 : i1 to i32
    %c0_i32_0 = arith.constant 0 : i32
    %2 = arith.cmpi ne, %1, %c0_i32_0 : i32
    scf.if %2 {
      %c0_17 = arith.constant 0 : index
      %c0_18 = arith.constant 0 : index
      %20 = vector.load %arg4[%c0_17, %c0_18] : memref<128x128xf32, #tpu.memory_space<vmem>>, vector<128x128xf32>
      %c0_19 = arith.constant 0 : index
      %c0_20 = arith.constant 0 : index
      %21 = vector.load %arg7[%c0_19, %c0_20] : memref<128x128xf32, #tpu.memory_space<vmem>>, vector<128x128xf32>
      tpu.vector_store %arg7[%c0_19, %c0_20], %20 {strides = array<i32>} : memref<128x128xf32, #tpu.memory_space<vmem>>, vector<128x128xf32>,
    } else {
    }
    %c0 = arith.constant 0 : index
    %c0_1 = arith.constant 0 : index
    %c0_2 = arith.constant 0 : index
    %3 = vector.load %arg2[%c0, %c0_1, %c0_2] : memref<2x128x128xf32, #tpu.memory_space<vmem>>, vector<1x128x128xf32>
    %4 = vector.shape_cast %3 : vector<1x128x128xf32> to vector<128x128xf32>
    %c0_3 = arith.constant 0 : index
    %c0_4 = arith.constant 0 : index
    %c0_5 = arith.constant 0 : index
    %5 = vector.load %arg3[%c0_3, %c0_4, %c0_5] : memref<2x128x128xf32, #tpu.memory_space<vmem>>, vector<1x128x128xf32>
    %6 = vector.shape_cast %5 : vector<1x128x128xf32> to vector<128x128xf32>
    %cst = arith.constant dense<0.000000e+00> : vector<128x128xf32>
    %7 = tpu.matmul %4, %6, %cst {dimension_numbers = #tpu.dot_dimension_numbers<[1], [0], [0], [1], [0, 0, 1, 1], [], []>} : vector<128x128xf32>, vector<128x128xf32>, vector<128x128xf32> -> vector<128x128xf32>
    %c1 = arith.constant 1 : index
    %c0_6 = arith.constant 0 : index
    %c0_7 = arith.constant 0 : index
    %8 = vector.load %arg2[%c1, %c0_6, %c0_7] : memref<2x128x128xf32, #tpu.memory_space<vmem>>, vector<1x128x128xf32>
    %9 = vector.shape_cast %8 : vector<1x128x128xf32> to vector<128x128xf32>
    %c1_8 = arith.constant 1 : index
    %c0_9 = arith.constant 0 : index
    %c0_10 = arith.constant 0 : index
    %10 = vector.load %arg3[%c1_8, %c0_9, %c0_10] : memref<2x128x128xf32, #tpu.memory_space<vmem>>, vector<1x128x128xf32>
    %11 = vector.shape_cast %10 : vector<1x128x128xf32> to vector<128x128xf32>
    %cst_11 = arith.constant dense<0.000000e+00> : vector<128x128xf32>
    %12 = tpu.matmul %9, %11, %cst_11 {dimension_numbers = #tpu.dot_dimension_numbers<[1], [0], [0], [1], [0, 0, 1, 1], [], []>} : vector<128x128xf32>, vector<128x128xf32>, vector<128x128xf32> -> vector<128x128xf32>
    %13 = arith.addf %7, %12 : vector<128x128xf32>
    %c0_12 = arith.constant 0 : index
    %c0_13 = arith.constant 0 : index
    %14 = vector.load %arg7[%c0_12, %c0_13] : memref<128x128xf32, #tpu.memory_space<vmem>>, vector<128x128xf32>
    %15 = arith.addf %14, %13 : vector<128x128xf32>
    %c0_14 = arith.constant 0 : index
    %c0_15 = arith.constant 0 : index
    %16 = vector.load %arg7[%c0_14, %c0_15] : memref<128x128xf32, #tpu.memory_space<vmem>>, vector<128x128xf32>
    tpu.vector_store %arg7[%c0_14, %c0_15], %15 {strides = array<i32>} : memref<128x128xf32, #tpu.memory_space<vmem>>, vector<128x128xf32>,
    %c3_i32 = arith.constant 3 : i32
    %17 = arith.cmpi eq, %arg1, %c3_i32 : i32
    %18 = arith.extui %17 : i1 to i32
    %c0_i32_16 = arith.constant 0 : i32
    %19 = arith.cmpi ne, %18, %c0_i32_16 : i32
    scf.if %19 {
      %c0_17 = arith.constant 0 : index
      %c0_18 = arith.constant 0 : index
      %20 = vector.load %arg7[%c0_17, %c0_18] : memref<128x128xf32, #tpu.memory_space<vmem>>, vector<128x128xf32>
      %c0_19 = arith.constant 0 : index
      %c0_20 = arith.constant 0 : index
      %21 = vector.load %arg5[%c0_19, %c0_20] : memref<1x128xf32, #tpu.memory_space<vmem>>, vector<1x128xf32>
      %22 = vector.broadcast %21 : vector<1x128xf32> to vector<128x128xf32>
      %23 = arith.addf %20, %22 : vector<128x128xf32>
      %cst_21 = arith.constant 0.000000e+00 : f32
      %24 = vector.broadcast %cst_21 : f32 to vector<128x128xf32>
      %25 = arith.maximumf %23, %24 : vector<128x128xf32>
      %c0_22 = arith.constant 0 : index
      %c0_23 = arith.constant 0 : index
      %26 = vector.load %arg6[%c0_22, %c0_23] : memref<128x128xf32, #tpu.memory_space<vmem>>, vector<128x128xf32>
      tpu.vector_store %arg6[%c0_22, %c0_23], %25 {strides = array<i32>} : memref<128x128xf32, #tpu.memory_space<vmem>>, vector<128x128xf32>,
    } else {
    }
    return
  }
  func.func @transform_0(%arg0: i32, %arg1: i32) -> (i32, i32, i32) {
    %c0_i32 = arith.constant 0 : i32
    %c0_i32_0 = arith.constant 0 : i32
    return %c0_i32, %arg0, %arg1 : i32, i32, i32
  }
  func.func @transform_1(%arg0: i32, %arg1: i32) -> (i32, i32, i32) {
    %c0_i32 = arith.constant 0 : i32
    %c0_i32_0 = arith.constant 0 : i32
    %c0_i32_1 = arith.constant 0 : i32
    return %c0_i32, %arg1, %c0_i32_0 : i32, i32, i32
  }
  func.func @transform_2(%arg0: i32, %arg1: i32) -> (i32, i32) {
    %c0_i32 = arith.constant 0 : i32
    %c0_i32_0 = arith.constant 0 : i32
    return %arg0, %c0_i32 : i32, i32
  }
  func.func @transform_3(%arg0: i32, %arg1: i32) -> (i32, i32) {
    %c0_i32 = arith.constant 0 : i32
    %c0_i32_0 = arith.constant 0 : i32
    %c0_i32_1 = arith.constant 0 : i32
    return %c0_i32, %c0_i32_0 : i32, i32
  }
  func.func @transform_4(%arg0: i32, %arg1: i32) -> (i32, i32) {
    %c0_i32 = arith.constant 0 : i32
    %c0_i32_0 = arith.constant 0 : i32
    return %arg0, %c0_i32 : i32, i32
  }
}

module attributes {stable_mosaic.version = 11 : i64} {
  func.func @_feat_transform_kernel(%arg0: i32, %arg1: memref<256x128xf32, #tpu.memory_space<vmem>>, %arg2: memref<128x384xf32, #tpu.memory_space<vmem>>, %arg3: memref<2x256x128xf32, #tpu.memory_space<vmem>>, %arg4: memref<256x128xf32, #tpu.memory_space<vmem>>) attributes {dimension_semantics = [#tpu.dimension_semantics<parallel>], iteration_bounds = array<i64: 2>, scalar_prefetch = 0 : i64, scratch_operands = 0 : i64, tpu.core_type = #tpu.core_type<tc>, window_params = [{transform_indices = @transform_0, window_bounds = array<i64: 256, 128>}, {pipeline_mode = #tpu.pipeline_mode<synchronous>, transform_indices = @transform_1, window_bounds = array<i64: 128, 384>}, {transform_indices = @transform_2, window_bounds = array<i64: 2, 256, 128>}, {transform_indices = @transform_3, window_bounds = array<i64: 256, 128>}]} {
    %c0 = arith.constant 0 : index
    %c0_0 = arith.constant 0 : index
    %0 = vector.load %arg1[%c0, %c0_0] : memref<256x128xf32, #tpu.memory_space<vmem>>, vector<256x128xf32>
    %c0_1 = arith.constant 0 : index
    %c0_2 = arith.constant 0 : index
    %1 = vector.load %arg2[%c0_1, %c0_2] : memref<128x384xf32, #tpu.memory_space<vmem>>, vector<128x384xf32>
    %cst = arith.constant dense<0.000000e+00> : vector<256x384xf32>
    %2 = tpu.matmul %0, %1, %cst {dimension_numbers = #tpu.dot_dimension_numbers<[1], [0], [0], [1], [0, 0, 1, 1], [], []>} : vector<256x128xf32>, vector<128x384xf32>, vector<256x384xf32> -> vector<256x384xf32>
    %3 = vector.extract_strided_slice %2 {offsets = [0, 0], sizes = [256, 128], strides = [1, 1]} : vector<256x384xf32> to vector<256x128xf32>
    %c0_3 = arith.constant 0 : index
    %c0_4 = arith.constant 0 : index
    %c0_5 = arith.constant 0 : index
    %4 = vector.load %arg3[%c0_3, %c0_4, %c0_5] : memref<2x256x128xf32, #tpu.memory_space<vmem>>, vector<1x256x128xf32>
    %5 = vector.shape_cast %4 : vector<1x256x128xf32> to vector<256x128xf32>
    %6 = vector.shape_cast %3 : vector<256x128xf32> to vector<1x256x128xf32>
    tpu.vector_store %arg3[%c0_3, %c0_4, %c0_5], %6 {strides = array<i32>} : memref<2x256x128xf32, #tpu.memory_space<vmem>>, vector<1x256x128xf32>,
    %7 = vector.extract_strided_slice %2 {offsets = [0, 128], sizes = [256, 128], strides = [1, 1]} : vector<256x384xf32> to vector<256x128xf32>
    %c1 = arith.constant 1 : index
    %c0_6 = arith.constant 0 : index
    %c0_7 = arith.constant 0 : index
    %8 = vector.load %arg3[%c1, %c0_6, %c0_7] : memref<2x256x128xf32, #tpu.memory_space<vmem>>, vector<1x256x128xf32>
    %9 = vector.shape_cast %8 : vector<1x256x128xf32> to vector<256x128xf32>
    %10 = vector.shape_cast %7 : vector<256x128xf32> to vector<1x256x128xf32>
    tpu.vector_store %arg3[%c1, %c0_6, %c0_7], %10 {strides = array<i32>} : memref<2x256x128xf32, #tpu.memory_space<vmem>>, vector<1x256x128xf32>,
    %11 = vector.extract_strided_slice %2 {offsets = [0, 256], sizes = [256, 128], strides = [1, 1]} : vector<256x384xf32> to vector<256x128xf32>
    %c0_8 = arith.constant 0 : index
    %c0_9 = arith.constant 0 : index
    %12 = vector.load %arg4[%c0_8, %c0_9] : memref<256x128xf32, #tpu.memory_space<vmem>>, vector<256x128xf32>
    tpu.vector_store %arg4[%c0_8, %c0_9], %11 {strides = array<i32>} : memref<256x128xf32, #tpu.memory_space<vmem>>, vector<256x128xf32>,
    return
  }
  func.func @transform_0(%arg0: i32) -> (i32, i32) {
    %c0_i32 = arith.constant 0 : i32
    %c0_i32_0 = arith.constant 0 : i32
    return %arg0, %c0_i32 : i32, i32
  }
  func.func @transform_1(%arg0: i32) -> (i32, i32) {
    %c0_i32 = arith.constant 0 : i32
    %c0_i32_0 = arith.constant 0 : i32
    %c0_i32_1 = arith.constant 0 : i32
    return %c0_i32, %c0_i32_0 : i32, i32
  }
  func.func @transform_2(%arg0: i32) -> (i32, i32, i32) {
    %c0_i32 = arith.constant 0 : i32
    %c0_i32_0 = arith.constant 0 : i32
    %c0_i32_1 = arith.constant 0 : i32
    return %c0_i32, %arg0, %c0_i32_0 : i32, i32, i32
  }
  func.func @transform_3(%arg0: i32) -> (i32, i32) {
    %c0_i32 = arith.constant 0 : i32
    %c0_i32_0 = arith.constant 0 : i32
    return %arg0, %c0_i32 : i32, i32
  }
}

</mosaic_0001>

<bundles_post_ra>
// kernel: rgcn_forward.3
= control target key start
LH: loop header
LB: loop body
LE: loop exit
PB: predicated region body
PF: predicated region fallthrough
CT: control target
= control target key end

     0   :  { %s2268_s0 = inlined_call_operand.hbm [shape: f32[2,512,512], index: 0, kind: input, shape index: {}]   ;;  %s2269_s1 = inlined_call_operand.vmem [shape: f32[2,512,128], index: 1, kind: input, shape index: {}]   ;;  %s2270_s2 = inlined_call_operand.vmem [shape: f32[512,128], index: 2, kind: input, shape index: {}]   ;;  %s2271_s3 = inlined_call_operand.hbm [shape: f32[1,128], index: 3, kind: input, shape index: {}]   ;;  %s2272_s4 = inlined_call_operand.hbm [shape: f32[512,128], index: 4, kind: output, shape index: {}]  }
   0x1   :  { %2289 = sst [smem:[#allocation26_spill]] %s2268_s0 }
   0x2   :  { %2290 = sst [smem:[#allocation27_spill]] %s2271_s3 }
   0x3   :  { %2291 = sst [smem:[#allocation28_spill]] %s2272_s4 }
   0x4   :  { %9 = vsyncpa [#allocation4], 0 }
   0x5   :  { %11 = vsyncpa [#allocation4 + $0x1], 0 }
   0x6   :  { %12 = vsyncpa [#allocation8], 0 }
   0x7   :  { %13 = vsyncpa [#allocation5], 0 }
   0x8   :  { %15 = vsyncpa [#allocation5 + $0x1], 0  ;;  %s1797_s15 = smov 0   ;;  %s1799_s16 = smov 0  }
   0x9   :  { %s1801_s17 = smov 0   ;;  %s1803_s18 = smov 0  }
   0xa   :  { %s1805_s19 = smov 0   ;;  %s1807_s20 = smov 0  }
   0xb   :  { %s1809_s21 = smov 0   ;;  %s1811_s22 = smov 0  }
   0xc   :  { %s1813_s23 = smov 0   ;;  %s1815_s24 = smov 0  }
   0xd   :  { %s1817_s25 = smov 0   ;;  %s1819_s26 = smov 0  }
   0xe   :  { %s1821_s27 = smov 0  }
   0xf LB: > { %2292 = sst [smem:[#allocation16_spill]] %s1711_s15  ;;  %s2273_s28 = sadd.s32 4294967295, %s1759_s27   ;;  %s1759_s27 = sphi %s1821_s27, %s21_s27   ;;  %s1755_s26 = sphi %s1819_s26, %s2344_s26   ;;  %s1751_s25 = sphi %s1817_s25, %s2343_s25   ;;  %s1747_s24 = sphi %s1815_s24, %s2331_s24   ;;  %s1743_s23 = sphi %s1813_s23, %s2342_s23   ;;  %s1739_s22 = sphi %s1811_s22, %s2341_s22   ;;  %s1735_s21 = sphi %s1809_s21, %s2340_s21   ;;  %s1731_s20 = sphi %s1807_s20, %s2339_s20   ;;  %s1727_s19 = sphi %s1805_s19, %s2338_s19   ;;  %s1723_s18 = sphi %s1803_s18, %s2337_s18   ;;  %s1719_s17 = sphi %s1801_s17, %s2328_s17   ;;  %s1715_s16 = sphi %s1799_s16, %s2336_s16   ;;  %s1711_s15 = sphi %s1797_s15, %s2335_s15  }
  0x10   : > { %2293 = sst [smem:[#allocation17_spill]] %s1719_s17  ;;  %s30_s30 = sadd.s32 1, %s1751_s25 }
  0x11   : > { %2294 = sst [smem:[#allocation18_spill]] %s1755_s26  ;;  %s33_s5 = sadd.s32 1, %s1755_s26 }
  0x12   : > { %2295 = sst [smem:[#allocation19_spill]] %s1759_s27  ;;  %p31_p0 = scmp.ge.s32.totalorder %s30_s30, 4 }
  0x13   : > { %s42_s6 = sadd.s32 1, %s1739_s22  ;;  %p49_p1 = scmp.ne.s32.totalorder %s1739_s22, %s1735_s21 }
  0x14   : > { %p50_p2 = scmp.eq.s32.totalorder %s1759_s27, 0  ;;  %s2346_s30 = smov (%p31_p0, %s30_s30), 0 }
  0x15   : > { %2296 = sst [smem:[#allocation20_spill]] %s2346_s30  ;;  %s2348_s5 = smov (!%p31_p0, %s33_s5), %s1755_s26 }
  0x16   : > { %s38_s7 = ssub.s32 %s1751_s25, %s2346_s30  ;;  %p1875_p3 = por %p50_p2, %p49_p1 }
  0x17   : > { %p35_p4 = scmp.ge.s32.totalorder %s2348_s5, 4  ;;  %p55_p5 = scmp.ne.s32.totalorder %s1735_s21, %s1731_s20 }
  0x18   : > { %s2297_s8 = scalar_select %p1875_p3, 1, 0 }
  0x19   : > { %p1882_p6 = scmp.eq.s32.totalorder %s2273_s28, 0  ;;  %p66_p7 = scmp.eq.s32.totalorder %s38_s7, 0 }
  0x1a   : > { %s2350_s5 = smov (%p35_p4, %s2348_s5), 0  ;;  %s68_s11 = sadd.s32 1, %s1727_s19 }
  0x1b   : > { %s2298_s9 = scalar_select %p1882_p6, 1, 0 }
  0x1c   : > { %2299 = sst [smem:[#allocation21_spill]] %s2350_s5  ;;  %p1890_p8 = por %p1882_p6, %p55_p5 }
  0x1d   : > { %s37_s12 = ssub.s32 %s1755_s26, %s2350_s5  ;;  %p75_p9 = scmp.ne.s32.totalorder %s1727_s19, %s1723_s18 }
  0x1e   : > { %s2300_s10 = scalar_select %p1890_p8, 1, 0 }
  0x1f   : > { %s39_s13 = sor.u32 %s38_s7, %s37_s12  ;;  %p139_p10 = scmp.eq.s32.totalorder %s37_s12, 0 }
  0x20   : > { %p40_p11 = scmp.eq.s32.totalorder %s39_s13, 0  ;;  %p1901_p12 = por %p75_p9, %p50_p2 }
  0x21   : > { %s1906_s20 = scalar_select %p66_p7, %s1727_s19, %s68_s11  }
  0x22   : > { %s2301_s14 = scalar_select %p1901_p12, 1, 0 }
  0x23   : > { %2302 = sst [smem:[#allocation22_spill]] %s1906_s20  ;;  %s141_s28 = sadd.s32 1, %s1719_s17 }
  0x24   : > { %s1909_s29 = scalar_select %p40_p11, %s1739_s22, %s42_s6  }
  0x25   : > { %p151_p13 = scmp.ne.s32.totalorder %s1719_s17, %s1715_s16  ;;  %s2305_s5 = sadd.s32 4294967295, %s1759_s27  }
  0x26   : > { %2303 = sst [smem:[#allocation23_spill]] %s1909_s29  ;;  %p152_p0 = scmp.eq.s32.totalorder %s2305_s5, 15 }
  0x27   : > { %s1915_s30 = scalar_select %p139_p10, %s1719_s17, %s141_s28  }
  0x28   : > { %p157_p1 = scmp.ne.s32.totalorder %s1715_s16, %s1711_s15  ;;  %s2306_s7 = sadd.s32 4294967294, %s1759_s27  }
  0x29   : > { %2304 = sst [smem:[#allocation24_spill]] %s1915_s30  ;;  %p158_p4 = scmp.eq.s32.totalorder %s2306_s7, 15 }
  0x2a   : > { %p1131_p5 = scmp.ge.s32.totalorder %s1759_s27, 1  ;;  %p1924_p8 = por %p152_p0, %p151_p13 }
  0x2b   : > { %p165_p2 = scmp.lt.s32.totalorder %s1759_s27, 17  ;;  %p1929_p7 = por %p158_p4, %p157_p1 }
  0x2c   : > { %s2307_s12 = scalar_select %p1924_p8, 1, 0 }
  0x2d   : > { %s2308_s11 = scalar_select %p1929_p7, 1, 0 }
  0x2e   : > { %p1933_p9 = pnand %p1131_p5, %p165_p2  ;;  %s1761_s28 = smov [#allocation7]  }
  0x2f   : > { %2309 = sst [smem:[#allocation25_spill]] %s2308_s11  ;;  %s178_s5 = sshll.u32 %s1761_s28, 4  ;;  %s179_s5 = int_to_ptr.vmem [resolvable:$true] %s178_s5 }
  0x30   : > { %s2310_s6 = scalar_select %p1933_p9, 1, 0 }
  0x31   : > { %p1464_p10 = pneg %p1933_p9  ;;  %s2312_s3 = sld [smem:[#allocation27_spill]] }
  0x33   : > { %p1941_p11 = pnand %p1464_p10, %p1882_p6 }
  0x35   : > { %p1591_p0 = pneg %p1941_p11 }
  0x37   : > { %s1589_s20 = scalar_lea.hbm %s2312_s3, 16 }
  0x38   : > { %p1590_p13 = scmp.ne.s32.totalorder %s2312_s3, %s1589_s20  ;;  %p1596_p5 = scmp.lt.u32.totalorder %s1589_s20, %s2312_s3 }
  0x3a   : > { %p1592_p1 = pnand %p1591_p0, %p1590_p13 }
  0x3c   : > { %p1593_p4 = pneg %p1592_p1 }
  0x3e   : > { %p1598_p2 = pnand %p1596_p5, %p1593_p4 }
  0x40   : > { %1601 = shalt.err (!%p1598_p2)
}
  0x41   : > { %s1602_s15 = scalar_lea.vmem %s179_s5, 16  ;;  %s1609_s29 = scalar_lea.vmem %s179_s5, 32 }
  0x42   : > { %p1603_p10 = scmp.ne.s32.totalorder %s179_s5, %s1602_s15  ;;  %p1610_p6 = scmp.lt.s32.totalorder %s179_s5, %s179_s5 }
  0x43   : > { %p1611_p9 = scmp.lt.s32.totalorder %s1609_s29, %s1602_s15 }
  0x44   : > { %p1605_p7 = pnand %p1603_p10, %p1591_p0 }
  0x45   : > { %p1612_p12 = por %p1611_p9, %p1610_p6 }
  0x46   : > { %p1606_p8 = pneg %p1605_p7 }
  0x48   : > { %p1613_p3 = pnand %p1612_p12, %p1606_p8 }
  0x4a   : > { %1616 = shalt.err (!%p1613_p3)
}
  0x4b   : > { %1467 = dma.hbm_to_vmem [thread:$0]  (!%p1941_p11), %s2312_s3, 16, %s179_s5, [#allocation8]  }
  0x4c   : > { %p1133_p13 = scmp.ge.s32.totalorder %s1759_s27, 16 }
  0x4e   : > { %185 = sbr.rel (%p1133_p13) target bundleno = 121 (0x79), region = 20 }
  0x55   : > { %s189_s20 = sand.u32 1, %s1739_s22   ;;  %s1190_s15 = sshll.u32 %s1755_s26, 6 }
  0x56   : > { %s1134_s11 = sshll.u32 %s189_s20, 8  ;;  %s199_s7 = sadd.s32 %s1751_s25, %s1190_s15 }
  0x57   : > { %s1137_s13 = sshll.u32 %s199_s7, 7  ;;  %s193_s28 = scalar_lea.vmem [#allocation3], %s1134_s11 }
  0x58   : > { %s214_s29 = sshll.u32 %s193_s28, 4  ;;  %s2313_s0 = sld [smem:[#allocation26_spill]]  ;;  %s215_s29 = int_to_ptr.vmem [resolvable:$true] %s214_s29 }
  0x59   : > { %p2314_p3 = scmp.ne.s32.totalorder %s2297_s8, 0  ;;  %s1762_s4 = smov 32768  }
  0x5a   : > { %s1763_s26 = smov 2048   ;;  %s1764_s15 = smov 16  }
  0x5b   : > { %s1451_s3 = scalar_select %p2314_p3, [#allocation0], [#allocation12] }
  0x5c   : > { %1452 = sst [smem:[#allocation11]] (%p2314_p3), %s1762_s4  ;;  %s1765_s11 = smov 512  }
  0x5d   : > { %s206_s27 = sld [smem:[%s1451_s3]]   ;;  %s1766_s7 = smov 128  }
  0x5e   : > { %s201_s30 = scalar_lea.hbm %s2313_s0, %s1137_s13  ;;  %1453 = sst [smem:[#allocation11 + $0x1]] (%p2314_p3), %s1763_s26 }
  0x5f   : > { %1454 = sst [smem:[#allocation11 + $0x2]] (%p2314_p3), %s1764_s15  ;;  %s1767_s13 = smov 8  }
  0x60   : > { %1455 = sst [smem:[#allocation11 + $0x3]] (%p2314_p3), %s1765_s11  ;;  %s190_s5 = scalar_lea.sflag [#allocation4], %s189_s20 }
  0x61   : > { %1456 = sst [smem:[#allocation11 + $0x4]] (%p2314_p3), %s1766_s7  ;;  %s1768_s17 = smov [#allocation10]  }
  0x62   : > { %1457 = sst [smem:[#allocation11 + $0x5]] (%p2314_p3), %s1767_s13  ;;  %p2315_p6 = scmp.ne.s32.totalorder %s2301_s14, 0 }
  0x63   : > { %s1138_s3 = sshll.u32 %s206_s27, 26  ;;  %s238_s4 = sand.u32 (%p2315_p6), 1, %s1727_s19  }
  0x64   : > { %s1139_s28 = sadd.s32 134217728, %s1138_s3  ;;  %236 = sbr.rel (!%p2315_p6) target bundleno = 121 (0x79), region = 28 }
  0x65   : > { %1458 = dma.general (%p2314_p3), %s201_s30, 4096, %s215_s29, %s190_s5, %s1768_s17, [#allocation11], %s1139_s28, 0  }
  0x66   : > { %s1191_s26 = sshll.u32 (%p2315_p6), %s1751_s25, 7  ;;  %s1140_s15 = sshll.u32 (%p2315_p6), %s238_s4, 8 }
  0x67   : > { %s1991_s7 = scalar_lea.vmem (%p2315_p6), %s2269_s1, %s1191_s26  ;;  %s1996_s27 = scalar_lea.vmem (%p2315_p6), [#allocation6], %s1140_s15 }
  0x68   : > { %v333_v0 = vld [vmem:[%s1991_s7] sm:$0xff] (%p2315_p6)  ;;  %v335_v1 = vld [vmem:[%s1991_s7 + $0x8] sm:$0xff] (%p2315_p6)  ;;  %v337_v2 = vld [vmem:[%s1991_s7 + $0x10] sm:$0xff] (%p2315_p6) }
  0x69   : > { %334 = vst [vmem:[%s1996_s27] sm:$0xff] (%p2315_p6), %v333_v0  ;;  %336 = vst [vmem:[%s1996_s27 + $0x8] sm:$0xff] (%p2315_p6), %v335_v1  ;;  %v339_v3 = vld [vmem:[%s1991_s7 + $0x18] sm:$0xff] (%p2315_p6)  ;;  %v341_v4 = vld [vmem:[%s1991_s7 + $0x20] sm:$0xff] (%p2315_p6) }
  0x6a   : > { %338 = vst [vmem:[%s1996_s27 + $0x10] sm:$0xff] (%p2315_p6), %v337_v2  ;;  %v343_v5 = vld [vmem:[%s1991_s7 + $0x28] sm:$0xff] (%p2315_p6)  ;;  %340 = vst [vmem:[%s1996_s27 + $0x18] sm:$0xff] (%p2315_p6), %v339_v3  ;;  %v345_v6 = vld [vmem:[%s1991_s7 + $0x30] sm:$0xff] (%p2315_p6) }
  0x6b   : > { %342 = vst [vmem:[%s1996_s27 + $0x20] sm:$0xff] %v341_v4  ;;  %344 = vst [vmem:[%s1996_s27 + $0x28] sm:$0xff] %v343_v5  ;;  %v347_v7 = vld [vmem:[%s1991_s7 + $0x38] sm:$0xff]  ;;  %v349_v8 = vld [vmem:[%s1991_s7 + $0x40] sm:$0xff] }
  0x6c   : > { %346 = vst [vmem:[%s1996_s27 + $0x30] sm:$0xff] %v345_v6  ;;  %348 = vst [vmem:[%s1996_s27 + $0x38] sm:$0xff] %v347_v7  ;;  %v351_v9 = vld [vmem:[%s1991_s7 + $0x48] sm:$0xff]  ;;  %v353_v10 = vld [vmem:[%s1991_s7 + $0x50] sm:$0xff] }
  0x6d   : > { %350 = vst [vmem:[%s1996_s27 + $0x40] sm:$0xff] %v349_v8  ;;  %v355_v11 = vld [vmem:[%s1991_s7 + $0x58] sm:$0xff]  ;;  %352 = vst [vmem:[%s1996_s27 + $0x48] sm:$0xff] %v351_v9  ;;  %v357_v12 = vld [vmem:[%s1991_s7 + $0x60] sm:$0xff] }
  0x6e   : > { %354 = vst [vmem:[%s1996_s27 + $0x50] sm:$0xff] %v353_v10  ;;  %356 = vst [vmem:[%s1996_s27 + $0x58] sm:$0xff] %v355_v11  ;;  %v359_v13 = vld [vmem:[%s1991_s7 + $0x68] sm:$0xff]  ;;  %v361_v14 = vld [vmem:[%s1991_s7 + $0x70] sm:$0xff] }
  0x6f   : > { %358 = vst [vmem:[%s1996_s27 + $0x60] sm:$0xff] %v357_v12  ;;  %360 = vst [vmem:[%s1996_s27 + $0x68] sm:$0xff] %v359_v13  ;;  %v363_v15 = vld [vmem:[%s1991_s7 + $0x78] sm:$0xff]  ;;  %v365_v16 = vld [vmem:[%s1991_s7 + $0x200] sm:$0xff] }
  0x70   : > { %362 = vst [vmem:[%s1996_s27 + $0x70] sm:$0xff] %v361_v14  ;;  %v367_v17 = vld [vmem:[%s1991_s7 + $0x208] sm:$0xff]  ;;  %364 = vst [vmem:[%s1996_s27 + $0x78] sm:$0xff] %v363_v15  ;;  %v369_v18 = vld [vmem:[%s1991_s7 + $0x210] sm:$0xff] }
  0x71   : > { %366 = vst [vmem:[%s1996_s27 + $0x80] sm:$0xff] %v365_v16  ;;  %368 = vst [vmem:[%s1996_s27 + $0x88] sm:$0xff] %v367_v17  ;;  %v371_v19 = vld [vmem:[%s1991_s7 + $0x218] sm:$0xff]  ;;  %v373_v20 = vld [vmem:[%s1991_s7 + $0x220] sm:$0xff] }
  0x72   : > { %370 = vst [vmem:[%s1996_s27 + $0x90] sm:$0xff] %v369_v18  ;;  %372 = vst [vmem:[%s1996_s27 + $0x98] sm:$0xff] %v371_v19  ;;  %v375_v21 = vld [vmem:[%s1991_s7 + $0x228] sm:$0xff]  ;;  %v377_v22 = vld [vmem:[%s1991_s7 + $0x230] sm:$0xff] }
  0x73   : > { %374 = vst [vmem:[%s1996_s27 + $0xa0] sm:$0xff] %v373_v20  ;;  %v379_v23 = vld [vmem:[%s1991_s7 + $0x238] sm:$0xff]  ;;  %376 = vst [vmem:[%s1996_s27 + $0xa8] sm:$0xff] %v375_v21  ;;  %v381_v24 = vld [vmem:[%s1991_s7 + $0x240] sm:$0xff] }
  0x74   : > { %378 = vst [vmem:[%s1996_s27 + $0xb0] sm:$0xff] %v377_v22  ;;  %380 = vst [vmem:[%s1996_s27 + $0xb8] sm:$0xff] %v379_v23  ;;  %v383_v25 = vld [vmem:[%s1991_s7 + $0x248] sm:$0xff]  ;;  %v385_v26 = vld [vmem:[%s1991_s7 + $0x250] sm:$0xff] }
  0x75   : > { %382 = vst [vmem:[%s1996_s27 + $0xc0] sm:$0xff] %v381_v24  ;;  %384 = vst [vmem:[%s1996_s27 + $0xc8] sm:$0xff] %v383_v25  ;;  %v387_v27 = vld [vmem:[%s1991_s7 + $0x258] sm:$0xff]  ;;  %v389_v28 = vld [vmem:[%s1991_s7 + $0x260] sm:$0xff] }
  0x76   : > { %386 = vst [vmem:[%s1996_s27 + $0xd0] sm:$0xff] %v385_v26  ;;  %v391_v29 = vld [vmem:[%s1991_s7 + $0x268] sm:$0xff]  ;;  %388 = vst [vmem:[%s1996_s27 + $0xd8] sm:$0xff] %v387_v27  ;;  %v393_v30 = vld [vmem:[%s1991_s7 + $0x270] sm:$0xff] }
  0x77   : > { %390 = vst [vmem:[%s1996_s27 + $0xe0] sm:$0xff] %v389_v28  ;;  %392 = vst [vmem:[%s1996_s27 + $0xe8] sm:$0xff] %v391_v29  ;;  %v395_v31 = vld [vmem:[%s1991_s7 + $0x278] sm:$0xff] }
  0x78   : > { %394 = vst [vmem:[%s1996_s27 + $0xf0] sm:$0xff] %v393_v30  ;;  %396 = vst [vmem:[%s1996_s27 + $0xf8] sm:$0xff] %v395_v31 }
  0x79 PF: > { %p2316_p8 = scmp.ne.s32.totalorder %s2310_s6, 0 }
  0x7a   : > { %s416_s0 = sand.u32 (!%p2316_p8), 1, %s1735_s21   ;;  %p2317_p12 = scmp.ne.s32.totalorder (!%p2316_p8), %s2300_s10, 0 }
  0x7b   : > { %414 = sbr.rel (%p2316_p8) target bundleno = 472 (0x1d8), region = 70  ;;  %s1144_s8 = sshll.u32 (!%p2316_p8), %s416_s0, 8 }
  0x7c   : > { %s417_s14 = scalar_lea.sflag (!%p2316_p8), [#allocation4], %s416_s0  ;;  %s2062_s20 = scalar_lea.vmem (!%p2316_p8), [#allocation3], %s1144_s8 }
  0x82   : > { %1698 = dma.done.wait (%p2317_p12), %s417_s14, 4096  }
  0x83   : > { %1700 = vsyncadd (%p2317_p12), %s417_s14, 4294963200  ;;  %s426_s29 = sand.u32 1, %s1723_s18   ;;  %p2318_p7 = scmp.ne.s32.totalorder %s2298_s9, 0 }
  0x84   : > { %s1145_s30 = sshll.u32 %s426_s29, 8 }
  0x85   : > { %s2069_s13 = scalar_lea.vmem [#allocation6], %s1145_s30 }
  0x86   : > { %1702 = dma.done.wait (%p2318_p7), [#allocation8], 16  }
  0x87   : > { %1704 = vsyncadd (%p2318_p7), [#allocation8], 4294967280  ;;  %s462_s6 = sand.u32 1, %s1715_s16   ;;  %s1148_s3 = sshll.u32 %s1747_s24, 4 }
  0x88   : > { %s1147_s28 = sshll.u32 %s462_s6, 7  ;;  %p468_p9 = scmp.lt.s32.totalorder %s1148_s3, 63 }
  0x89   : > { %s2084_s4 = scalar_lea.vmem [#allocation9], %s1147_s28  ;;  %p1150_p11 = scmp.ne.s32.totalorder %s1743_s23, 0 }
  0x8a   : > { %s2352_s3 = smov (!%p468_p9, %s1148_s3), 63 }
  0x8b   : > { %s1149_s10 = sshll.u32 %s2352_s3, 3  ;;  %477 = sbr.rel (%p1150_p11) target bundleno = 150 (0x96), region = 86 }
  0x8c   : > { %s2082_s17 = scalar_lea.vmem %s2270_s2, %s1149_s10 }
  0x8d   : > { %v478_v32 = vld [vmem:[%s2082_s17] sm:$0xff] (!%p1150_p11)  ;;  %v479_v33 = vld [vmem:[%s2082_s17 + $0x8] sm:$0xff] (!%p1150_p11)  ;;  %v480_v34 = vld [vmem:[%s2082_s17 + $0x10] sm:$0xff] (!%p1150_p11) }
  0x8e   : > { %494 = vst [vmem:[#allocation2] sm:$0xff] (!%p1150_p11), %v478_v32  ;;  %495 = vst [vmem:[#allocation2 + $0x8] sm:$0xff] (!%p1150_p11), %v479_v33  ;;  %v481_v35 = vld [vmem:[%s2082_s17 + $0x18] sm:$0xff] (!%p1150_p11)  ;;  %v482_v36 = vld [vmem:[%s2082_s17 + $0x20] sm:$0xff] (!%p1150_p11) }
  0x8f   : > { %496 = vst [vmem:[#allocation2 + $0x10] sm:$0xff] (!%p1150_p11), %v480_v34  ;;  %v483_v37 = vld [vmem:[%s2082_s17 + $0x28] sm:$0xff] (!%p1150_p11)  ;;  %497 = vst [vmem:[#allocation2 + $0x18] sm:$0xff] (!%p1150_p11), %v481_v35  ;;  %v484_v38 = vld [vmem:[%s2082_s17 + $0x30] sm:$0xff] (!%p1150_p11) }
  0x90   : > { %498 = vst [vmem:[#allocation2 + $0x20] sm:$0xff] (!%p1150_p11), %v482_v36  ;;  %499 = vst [vmem:[#allocation2 + $0x28] sm:$0xff] (!%p1150_p11), %v483_v37  ;;  %v485_v39 = vld [vmem:[%s2082_s17 + $0x38] sm:$0xff] (!%p1150_p11)  ;;  %v486_v40 = vld [vmem:[%s2082_s17 + $0x40] sm:$0xff] (!%p1150_p11) }
  0x91   : > { %500 = vst [vmem:[#allocation2 + $0x30] sm:$0xff] (!%p1150_p11), %v484_v38  ;;  %501 = vst [vmem:[#allocation2 + $0x38] sm:$0xff] (!%p1150_p11), %v485_v39  ;;  %v487_v41 = vld [vmem:[%s2082_s17 + $0x48] sm:$0xff] (!%p1150_p11)  ;;  %v488_v42 = vld [vmem:[%s2082_s17 + $0x50] sm:$0xff] (!%p1150_p11) }
  0x92   : > { %502 = vst [vmem:[#allocation2 + $0x40] sm:$0xff] %v486_v40  ;;  %v489_v43 = vld [vmem:[%s2082_s17 + $0x58] sm:$0xff]  ;;  %503 = vst [vmem:[#allocation2 + $0x48] sm:$0xff] %v487_v41  ;;  %v490_v44 = vld [vmem:[%s2082_s17 + $0x60] sm:$0xff] }
  0x93   : > { %504 = vst [vmem:[#allocation2 + $0x50] sm:$0xff] %v488_v42  ;;  %505 = vst [vmem:[#allocation2 + $0x58] sm:$0xff] %v489_v43  ;;  %v491_v45 = vld [vmem:[%s2082_s17 + $0x68] sm:$0xff]  ;;  %v492_v46 = vld [vmem:[%s2082_s17 + $0x70] sm:$0xff] }
  0x94   : > { %506 = vst [vmem:[#allocation2 + $0x60] sm:$0xff] %v490_v44  ;;  %507 = vst [vmem:[#allocation2 + $0x68] sm:$0xff] %v491_v45  ;;  %v493_v47 = vld [vmem:[%s2082_s17 + $0x78] sm:$0xff] }
  0x95   : > { %508 = vst [vmem:[#allocation2 + $0x70] sm:$0xff] %v492_v46  ;;  %509 = vst [vmem:[#allocation2 + $0x78] sm:$0xff] %v493_v47 }
  0x96 PF: > { %v1167_v48 = vld [vmem:[%s2069_s13 + $0x80] sm:$0xff]  ;;  %v1168_v49 = vld [vmem:[%s2069_s13 + $0x88] sm:$0xff]  ;;  %v1169_v53 = vld [vmem:[%s2069_s13 + $0x90] sm:$0xff]  ;;  %p1183_p0 = scmp.ne.s32.totalorder %s1743_s23, 3 }
  0x97   : > { %v526_v50 = vld [vmem:[%s2069_s13] sm:$0xff]  ;;  %v1369_v51 = vpack.c.bf16 %v1168_v49, %v1167_v48  ;;  %v527_v52 = vld [vmem:[%s2069_s13 + $0x8] sm:$0xff]  ;;  %v1170_v54 = vld [vmem:[%s2069_s13 + $0x98] sm:$0xff] }
  0x98   : > { %v1401_v55 = vpack.c.bf16 %v527_v52, %v526_v50  ;;  %v1373_v56 = vpack.c.bf16 %v1170_v54, %v1169_v53  ;;  %v528_v57 = vld [vmem:[%s2069_s13 + $0x10] sm:$0xff]  ;;  %v529_v58 = vld [vmem:[%s2069_s13 + $0x18] sm:$0xff]  ;;  %v1171_v59 = vld [vmem:[%s2069_s13 + $0xa0] sm:$0xff] }
  0x99   : > { %1370 = vmatprep.subr.bf16.mxu1 %v1369_v51  ;;  %v1405_v60 = vpack.c.bf16 %v529_v58, %v528_v57  ;;  %v1172_v61 = vld [vmem:[%s2069_s13 + $0xa8] sm:$0xff]  ;;  %v530_v62 = vld [vmem:[%s2069_s13 + $0x20] sm:$0xff]  ;;  %v1173_v2 = vld [vmem:[%s2069_s13 + $0xb0] sm:$0xff] }
  0x9a   : > { %v531_v63 = vld [vmem:[%s2069_s13 + $0x28] sm:$0xff]  ;;  %1402 = vmatprep.subr.bf16.mxu0 %v1401_v55  ;;  %1372 = vmatpush3.bf16.msra.mxu1 %v1369_v51  ;;  %v1377_v0 = vpack.c.bf16 %v1172_v61, %v1171_v59  ;;  %v1174_v3 = vld [vmem:[%s2069_s13 + $0xb8] sm:$0xff]  ;;  %v532_v4 = vld [vmem:[%s2069_s13 + $0x30] sm:$0xff] }
  0x9b   : > { %1404 = vmatpush3.bf16.msra.mxu0 %v1401_v55  ;;  %1374 = vmatprep.subr.bf16.mxu1 %v1373_v56  ;;  %v1409_v1 = vpack.c.bf16 %v531_v63, %v530_v62  ;;  %v533_v5 = vld [vmem:[%s2069_s13 + $0x38] sm:$0xff]  ;;  %v1381_v6 = vpack.c.bf16 %v1174_v3, %v1173_v2  ;;  %v1175_v8 = vld [vmem:[%s2069_s13 + $0xc0] sm:$0xff]  ;;  %v1176_v9 = vld [vmem:[%s2069_s13 + $0xc8] sm:$0xff] }
  0x9c   : > { %1406 = vmatprep.subr.bf16.mxu0 %v1405_v60  ;;  %v1413_v7 = vpack.c.bf16 %v533_v5, %v532_v4  ;;  %v1151_v10 = vld [vmem:[%s2062_s20 + $0x80] sm:$0xff]  ;;  %v535_v12 = vld [vmem:[%s2069_s13 + $0x48] sm:$0xff]  ;;  %v1385_v14 = vpack.c.bf16 %v1176_v9, %v1175_v8  ;;  %v1177_v16 = vld [vmem:[%s2069_s13 + $0xd0] sm:$0xff] }
  0x9d   : > { %v534_v11 = vld [vmem:[%s2069_s13 + $0x40] sm:$0xff]  ;;  %1289 = vmatprep.mubr.f32.mxu1 %v1151_v10  ;;  %v1178_v17 = vld [vmem:[%s2069_s13 + $0xd8] sm:$0xff]  ;;  %v536_v18 = vld [vmem:[%s2069_s13 + $0x50] sm:$0xff] }
  0x9e   : > { %1376 = vmatpush3.bf16.msra.mxu1 %v1373_v56  ;;  %v510_v13 = vld [vmem:[%s2062_s20] sm:$0xff]  ;;  %v1417_v15 = vpack.c.bf16 %v535_v12, %v534_v11  ;;  %v537_v19 = vld [vmem:[%s2069_s13 + $0x58] sm:$0xff]  ;;  %v1389_v20 = vpack.c.bf16 %v1178_v17, %v1177_v16  ;;  %v1180_v23 = vld [vmem:[%s2069_s13 + $0xe8] sm:$0xff] }
  0x9f   : > { %1408 = vmatpush3.bf16.msra.mxu0 %v1405_v60  ;;  %1378 = vmatprep.subr.bf16.mxu1 %v1377_v0  ;;  %v1421_v21 = vpack.c.bf16 %v537_v19, %v536_v18  ;;  %v1179_v22 = vld [vmem:[%s2069_s13 + $0xe0] sm:$0xff]  ;;  %v539_v25 = vld [vmem:[%s2069_s13 + $0x68] sm:$0xff]  ;;  %v1181_v28 = vld [vmem:[%s2069_s13 + $0xf0] sm:$0xff] }
  0xa0   : > { %1410 = vmatprep.subr.bf16.mxu0 %v1409_v1  ;;  %1345 = vmatprep.mubr.f32.mxu0 %v510_v13  ;;  %v538_v24 = vld [vmem:[%s2069_s13 + $0x60] sm:$0xff]  ;;  %v1393_v26 = vpack.c.bf16 %v1180_v23, %v1179_v22  ;;  %v1182_v29 = vld [vmem:[%s2069_s13 + $0xf8] sm:$0xff]  ;;  %v540_v30 = vld [vmem:[%s2069_s13 + $0x70] sm:$0xff] }
  0xa1   : > { %v1425_v27 = vpack.c.bf16 %v539_v25, %v538_v24  ;;  %v541_v31 = vld [vmem:[%s2069_s13 + $0x78] sm:$0xff]  ;;  %v1397_v32 = vpack.c.bf16 %v1182_v29, %v1181_v28  ;;  %v1152_v34 = vld [vmem:[%s2062_s20 + $0x88] sm:$0xff]  ;;  %v1153_v36 = vld [vmem:[%s2062_s20 + $0x90] sm:$0xff] }
  0xa2   : > { %1380 = vmatpush3.bf16.msra.mxu1 %v1377_v0  ;;  %v1429_v33 = vpack.c.bf16 %v541_v31, %v540_v30  ;;  %v511_v35 = vld [vmem:[%s2062_s20 + $0x8] sm:$0xff]  ;;  %v512_v37 = vld [vmem:[%s2062_s20 + $0x10] sm:$0xff]  ;;  %v1154_v38 = vld [vmem:[%s2062_s20 + $0x98] sm:$0xff] }
  0xa3   : > { %1412 = vmatpush3.bf16.msra.mxu0 %v1409_v1  ;;  %1382 = vmatprep.subr.bf16.mxu1 %v1381_v6  ;;  %v513_v39 = vld [vmem:[%s2062_s20 + $0x18] sm:$0xff]  ;;  %v1155_v40 = vld [vmem:[%s2062_s20 + $0xa0] sm:$0xff]  ;;  %v1156_v42 = vld [vmem:[%s2062_s20 + $0xa8] sm:$0xff] }
  0xa4   : > { %1414 = vmatprep.subr.bf16.mxu0 %v1413_v7  ;;  %v514_v41 = vld [vmem:[%s2062_s20 + $0x20] sm:$0xff]  ;;  %v515_v43 = vld [vmem:[%s2062_s20 + $0x28] sm:$0xff]  ;;  %v1157_v44 = vld [vmem:[%s2062_s20 + $0xb0] sm:$0xff] }
  0xa5   : > { %v516_v45 = vld [vmem:[%s2062_s20 + $0x30] sm:$0xff]  ;;  %v1158_v46 = vld [vmem:[%s2062_s20 + $0xb8] sm:$0xff]  ;;  %v1159_v48 = vld [vmem:[%s2062_s20 + $0xc0] sm:$0xff] }
  0xa6   : > { %1384 = vmatpush3.bf16.msra.mxu1 %v1381_v6  ;;  %v517_v47 = vld [vmem:[%s2062_s20 + $0x38] sm:$0xff]  ;;  %v518_v49 = vld [vmem:[%s2062_s20 + $0x40] sm:$0xff]  ;;  %v1160_v50 = vld [vmem:[%s2062_s20 + $0xc8] sm:$0xff] }
  0xa7   : > { %1416 = vmatpush3.bf16.msra.mxu0 %v1413_v7  ;;  %1386 = vmatprep.subr.bf16.mxu1 %v1385_v14  ;;  %v519_v51 = vld [vmem:[%s2062_s20 + $0x48] sm:$0xff]  ;;  %v1161_v52 = vld [vmem:[%s2062_s20 + $0xd0] sm:$0xff]  ;;  %v1162_v54 = vld [vmem:[%s2062_s20 + $0xd8] sm:$0xff] }
  0xa8   : > { %1418 = vmatprep.subr.bf16.mxu0 %v1417_v15  ;;  %v520_v53 = vld [vmem:[%s2062_s20 + $0x50] sm:$0xff]  ;;  %v521_v55 = vld [vmem:[%s2062_s20 + $0x58] sm:$0xff]  ;;  %v1163_v56 = vld [vmem:[%s2062_s20 + $0xe0] sm:$0xff] }
  0xa9   : > { %v522_v57 = vld [vmem:[%s2062_s20 + $0x60] sm:$0xff]  ;;  %v1164_v58 = vld [vmem:[%s2062_s20 + $0xe8] sm:$0xff]  ;;  %v1165_v60 = vld [vmem:[%s2062_s20 + $0xf0] sm:$0xff] }
  0xaa   : > { %1388 = vmatpush3.bf16.msra.mxu1 %v1385_v14  ;;  %v523_v59 = vld [vmem:[%s2062_s20 + $0x68] sm:$0xff]  ;;  %v524_v61 = vld [vmem:[%s2062_s20 + $0x70] sm:$0xff]  ;;  %v1166_v62 = vld [vmem:[%s2062_s20 + $0xf8] sm:$0xff] }
  0xab   : > { %1420 = vmatpush3.bf16.msra.mxu0 %v1417_v15  ;;  %1390 = vmatprep.subr.bf16.mxu1 %v1389_v20  ;;  %v525_v63 = vld [vmem:[%s2062_s20 + $0x78] sm:$0xff]  ;;  %v867_v2 = vld [vmem:[#allocation2 + $0x8] sm:$0xff]  ;;  %v866_v6 = vld [vmem:[#allocation2] sm:$0xff] }
  0xac   : > { %1422 = vmatprep.subr.bf16.mxu0 %v1421_v21  ;;  %v869_v12 = vld [vmem:[#allocation2 + $0x18] sm:$0xff]  ;;  %v868_v16 = vld [vmem:[#allocation2 + $0x10] sm:$0xff]  ;;  %v871_v22 = vld [vmem:[#allocation2 + $0x28] sm:$0xff] }
  0xae   : > { %1392 = vmatpush3.bf16.msra.mxu1 %v1389_v20 }
  0xaf   : > { %1424 = vmatpush3.bf16.msra.mxu0 %v1421_v21  ;;  %1394 = vmatprep.subr.bf16.mxu1 %v1393_v26 }
  0xb0   : > { %1426 = vmatprep.subr.bf16.mxu0 %v1425_v27 }
  0xb2   : > { %1396 = vmatpush3.bf16.msra.mxu1 %v1393_v26  ;;  %v870_v26 = vld [vmem:[#allocation2 + $0x20] sm:$0xff] }
  0xb3   : > { %1428 = vmatpush3.bf16.msra.mxu0 %v1425_v27  ;;  %1398 = vmatprep.subr.bf16.mxu1 %v1397_v32 }
  0xb4   : > { %1430 = vmatprep.subr.bf16.mxu0 %v1429_v33 }
  0xb6   : > { %1400 = vmatpush3.bf16.msra.mxu1 %v1397_v32  ;;  %v873_v32 = vld [vmem:[#allocation2 + $0x38] sm:$0xff] }
  0xb7   : > { %1432 = vmatpush3.bf16.msra.mxu0 %v1429_v33 }
  0xb9   : > { %1290 = vmatmul.mubr.f32.vlgmr.msra.gmra.mrb[0].mxu1 %v1152_v34 }
  0xba   : > { %1346 = vmatmul.mubr.f32.vlgmr.msra.gmra.mrb[0].mxu0 %v511_v35  ;;  %1292 = vmatprep.mubr.f32.mxu1 %v1153_v36  ;;  %v872_v36 = vld [vmem:[#allocation2 + $0x30] sm:$0xff] }
  0xbb   : > { %1348 = vmatprep.mubr.f32.mxu0 %v512_v37 }
  0xbd   : > { %1293 = vmatmul.mubr.f32.gmra.mrb[2].mxu1 %v1154_v38 }
  0xbe   : > { %1349 = vmatmul.mubr.f32.gmra.mrb[2].mxu0 %v513_v39  ;;  %1295 = vmatprep.mubr.f32.mxu1 %v1155_v40 }
  0xbf   : > { %1351 = vmatprep.mubr.f32.mxu0 %v514_v41 }
  0xc1   : > { %1296 = vmatmul.mubr.f32.gmra.mrb[4].mxu1 %v1156_v42  ;;  %v875_v42 = vld [vmem:[#allocation2 + $0x48] sm:$0xff] }
  0xc2   : > { %1352 = vmatmul.mubr.f32.gmra.mrb[4].mxu0 %v515_v43  ;;  %1298 = vmatprep.mubr.f32.mxu1 %v1157_v44 }
  0xc3   : > { %1354 = vmatprep.mubr.f32.mxu0 %v516_v45 }
  0xc5   : > { %1299 = vmatmul.mubr.f32.gmra.mrb[6].mxu1 %v1158_v46  ;;  %v874_v46 = vld [vmem:[#allocation2 + $0x40] sm:$0xff] }
  0xc6   : > { %1355 = vmatmul.mubr.f32.gmra.mrb[6].mxu0 %v517_v47  ;;  %1301 = vmatprep.mubr.f32.mxu1 %v1159_v48 }
  0xc7   : > { %1357 = vmatprep.mubr.f32.mxu0 %v518_v49 }
  0xc9   : > { %1302 = vmatmul.mubr.f32.gmra.mrb[8].mxu1 %v1160_v50 }
  0xca   : > { %1358 = vmatmul.mubr.f32.gmra.mrb[8].mxu0 %v519_v51  ;;  %1304 = vmatprep.mubr.f32.mxu1 %v1161_v52  ;;  %v877_v52 = vld [vmem:[#allocation2 + $0x58] sm:$0xff] }
  0xcb   : > { %1360 = vmatprep.mubr.f32.mxu0 %v520_v53 }
  0xcd   : > { %1305 = vmatmul.mubr.f32.gmra.mrb[10].mxu1 %v1162_v54 }
  0xce   : > { %1361 = vmatmul.mubr.f32.gmra.mrb[10].mxu0 %v521_v55  ;;  %1307 = vmatprep.mubr.f32.mxu1 %v1163_v56  ;;  %v876_v56 = vld [vmem:[#allocation2 + $0x50] sm:$0xff] }
  0xcf   : > { %1363 = vmatprep.mubr.f32.mxu0 %v522_v57 }
  0xd1   : > { %1308 = vmatmul.mubr.f32.gmra.mrb[12].mxu1 %v1164_v58 }
  0xd2   : > { %1364 = vmatmul.mubr.f32.gmra.mrb[12].mxu0 %v523_v59  ;;  %1310 = vmatprep.mubr.f32.mxu1 %v1165_v60 }
  0xd3   : > { %1366 = vmatprep.mubr.f32.mxu0 %v524_v61 }
  0xd5   : > { %1311 = vmatmul.mubr.f32.gmra.mrb[14].mxu1 %v1166_v62  ;;  %v879_v62 = vld [vmem:[#allocation2 + $0x68] sm:$0xff] }
  0xd6   : > { %1367 = vmatmul.mubr.f32.gmra.mrb[14].mxu0 %v525_v63 }
 0x18c   : > { %v1291_v0 = vpop.f32.mrb[0].mxu1 }
 0x18d   : > { %v1347_v1 = vpop.f32.mrb[0].mxu0  ;;  %v642_v3 = vpop.f32.mrb[1].mxu1 }
 0x18e   : > { %v793_v4 = vadd.f32 %v1347_v1, %v1291_v0  ;;  %v787_v5 = vpop.f32.mrb[1].mxu0 }
 0x18f   : > { %v788_v7 = vadd.f32 %v787_v5, %v642_v3 }
 0x190   : > { %v883_v8 = vadd.f32 %v867_v2, %v793_v4  ;;  %v1294_v9 = vpop.f32.mrb[2].mxu1  ;;  %v878_v2 = vld [vmem:[#allocation2 + $0x60] sm:$0xff] }
 0x191   : > { %v882_v10 = vadd.f32 %v866_v6, %v788_v7  ;;  %v1350_v11 = vpop.f32.mrb[2].mxu0  ;;  %v652_v13 = vpop.f32.mrb[3].mxu1 }
 0x192   : > { %899 = vst [vmem:[#allocation2 + $0x8] sm:$0xff] %v883_v8  ;;  %v803_v14 = vadd.f32 %v1350_v11, %v1294_v9  ;;  %v797_v15 = vpop.f32.mrb[3].mxu0  ;;  %v881_v8 = vld [vmem:[#allocation2 + $0x78] sm:$0xff] }
 0x193   : > { %898 = vst [vmem:[#allocation2] sm:$0xff] %v882_v10  ;;  %v798_v17 = vadd.f32 %v797_v15, %v652_v13 }
 0x194   : > { %v885_v18 = vadd.f32 %v869_v12, %v803_v14  ;;  %v1297_v19 = vpop.f32.mrb[4].mxu1  ;;  %v880_v12 = vld [vmem:[#allocation2 + $0x70] sm:$0xff] }
 0x195   : > { %v884_v20 = vadd.f32 %v868_v16, %v798_v17  ;;  %v1353_v21 = vpop.f32.mrb[4].mxu0  ;;  %v662_v23 = vpop.f32.mrb[5].mxu1  ;;  %v1184_v17 = vld [vmem:[#allocation7] ss:$0 sm:$0xff] (!%p1183_p0) }
 0x196   : > { %901 = vst [vmem:[#allocation2 + $0x18] sm:$0xff] %v885_v18  ;;  %v813_v24 = vadd.f32 %v1353_v21, %v1297_v19  ;;  %v807_v25 = vpop.f32.mrb[5].mxu0 }
 0x197   : > { %900 = vst [vmem:[#allocation2 + $0x10] sm:$0xff] %v884_v20  ;;  %v808_v27 = vadd.f32 %v807_v25, %v662_v23 }
 0x198   : > { %v887_v28 = vadd.f32 %v871_v22, %v813_v24  ;;  %v1300_v29 = vpop.f32.mrb[6].mxu1 }
 0x199   : > { %v886_v30 = vadd.f32 %v870_v26, %v808_v27  ;;  %v1356_v31 = vpop.f32.mrb[6].mxu0  ;;  %v672_v33 = vpop.f32.mrb[7].mxu1  ;;  %v919_v18 = vld [vmem:[#allocation2 + $0x8] sm:$0xff] (!%p1183_p0) }
 0x19a   : > { %903 = vst [vmem:[#allocation2 + $0x28] sm:$0xff] %v887_v28  ;;  %v823_v34 = vadd.f32 %v1356_v31, %v1300_v29  ;;  %v817_v35 = vpop.f32.mrb[7].mxu0  ;;  %v918_v16 = vld [vmem:[#allocation2] sm:$0xff] (!%p1183_p0)  ;;  %v942_v20 = vadd.f32 (!%p1183_p0), %v1184_v17, %v919_v18 }
 0x19b   : > { %902 = vst [vmem:[#allocation2 + $0x20] sm:$0xff] %v886_v30  ;;  %v818_v37 = vadd.f32 %v817_v35, %v672_v33  ;;  %v941_v19 = vadd.f32 (!%p1183_p0), %v1184_v17, %v918_v16 }
 0x19c   : > { %v889_v38 = vadd.f32 %v873_v32, %v823_v34  ;;  %v1303_v39 = vpop.f32.mrb[8].mxu1  ;;  %v958_v31 = vmax.f32 (!%p1183_p0), %v942_v20, 0.0 }
 0x19d   : > { %v888_v40 = vadd.f32 %v872_v36, %v818_v37  ;;  %v1359_v41 = vpop.f32.mrb[8].mxu0  ;;  %v682_v43 = vpop.f32.mrb[9].mxu1  ;;  %v921_v22 = vld [vmem:[#allocation2 + $0x18] sm:$0xff] (!%p1183_p0)  ;;  %v957_v30 = vmax.f32 (!%p1183_p0), %v941_v19, 0.0 }
 0x19e   : > { %905 = vst [vmem:[#allocation2 + $0x38] sm:$0xff] %v889_v38  ;;  %v833_v44 = vadd.f32 %v1359_v41, %v1303_v39  ;;  %v827_v45 = vpop.f32.mrb[9].mxu0  ;;  %v920_v21 = vld [vmem:[#allocation2 + $0x10] sm:$0xff] (!%p1183_p0)  ;;  %v944_v25 = vadd.f32 (!%p1183_p0), %v1184_v17, %v921_v22  ;;  %974 = vst [vmem:[%s2084_s4 + $0x8] sm:$0xff] (!%p1183_p0), %v958_v31 }
 0x19f   : > { %904 = vst [vmem:[#allocation2 + $0x30] sm:$0xff] %v888_v40  ;;  %v828_v47 = vadd.f32 %v827_v45, %v682_v43  ;;  %v943_v24 = vadd.f32 (!%p1183_p0), %v1184_v17, %v920_v21  ;;  %973 = vst [vmem:[%s2084_s4] sm:$0xff] (!%p1183_p0), %v957_v30 }
 0x1a0   : > { %v891_v48 = vadd.f32 %v875_v42, %v833_v44  ;;  %v1306_v49 = vpop.f32.mrb[10].mxu1  ;;  %v960_v38 = vmax.f32 (!%p1183_p0), %v944_v25, 0.0 }
 0x1a1   : > { %v890_v50 = vadd.f32 %v874_v46, %v828_v47  ;;  %v1362_v51 = vpop.f32.mrb[10].mxu0  ;;  %v692_v53 = vpop.f32.mrb[11].mxu1  ;;  %v923_v27 = vld [vmem:[#allocation2 + $0x28] sm:$0xff] (!%p1183_p0)  ;;  %v959_v37 = vmax.f32 (!%p1183_p0), %v943_v24, 0.0 }
 0x1a2   : > { %907 = vst [vmem:[#allocation2 + $0x48] sm:$0xff] %v891_v48  ;;  %v843_v54 = vadd.f32 %v1362_v51, %v1306_v49  ;;  %v837_v55 = vpop.f32.mrb[11].mxu0  ;;  %v922_v23 = vld [vmem:[#allocation2 + $0x20] sm:$0xff] (!%p1183_p0)  ;;  %v946_v32 = vadd.f32 (!%p1183_p0), %v1184_v17, %v923_v27  ;;  %976 = vst [vmem:[%s2084_s4 + $0x18] sm:$0xff] (!%p1183_p0), %v960_v38 }
 0x1a3   : > { %906 = vst [vmem:[#allocation2 + $0x40] sm:$0xff] %v890_v50  ;;  %v838_v57 = vadd.f32 %v837_v55, %v692_v53  ;;  %v945_v26 = vadd.f32 (!%p1183_p0), %v1184_v17, %v922_v23  ;;  %975 = vst [vmem:[%s2084_s4 + $0x10] sm:$0xff] (!%p1183_p0), %v959_v37 }
 0x1a4   : > { %v893_v58 = vadd.f32 %v877_v52, %v843_v54  ;;  %v1309_v59 = vpop.f32.mrb[12].mxu1  ;;  %v962_v44 = vmax.f32 (!%p1183_p0), %v946_v32, 0.0 }
 0x1a5   : > { %v892_v60 = vadd.f32 %v876_v56, %v838_v57  ;;  %v1365_v61 = vpop.f32.mrb[12].mxu0  ;;  %v702_v63 = vpop.f32.mrb[13].mxu1  ;;  %v925_v29 = vld [vmem:[#allocation2 + $0x38] sm:$0xff] (!%p1183_p0)  ;;  %v961_v39 = vmax.f32 (!%p1183_p0), %v945_v26, 0.0 }
 0x1a6   : > { %909 = vst [vmem:[#allocation2 + $0x58] sm:$0xff] %v893_v58  ;;  %v853_v0 = vadd.f32 %v1365_v61, %v1309_v59  ;;  %v847_v1 = vpop.f32.mrb[13].mxu0  ;;  %v924_v28 = vld [vmem:[#allocation2 + $0x30] sm:$0xff] (!%p1183_p0)  ;;  %v948_v40 = vadd.f32 (!%p1183_p0), %v1184_v17, %v925_v29  ;;  %978 = vst [vmem:[%s2084_s4 + $0x28] sm:$0xff] (!%p1183_p0), %v962_v44 }
 0x1a7   : > { %908 = vst [vmem:[#allocation2 + $0x50] sm:$0xff] %v892_v60  ;;  %v848_v3 = vadd.f32 %v847_v1, %v702_v63  ;;  %v947_v33 = vadd.f32 (!%p1183_p0), %v1184_v17, %v924_v28  ;;  %977 = vst [vmem:[%s2084_s4 + $0x20] sm:$0xff] (!%p1183_p0), %v961_v39 }
 0x1a8   : > { %v895_v4 = vadd.f32 %v879_v62, %v853_v0  ;;  %v1312_v5 = vpop.f32.mrb[14].mxu1  ;;  %v964_v50 = vmax.f32 (!%p1183_p0), %v948_v40, 0.0 }
 0x1a9   : > { %v894_v6 = vadd.f32 %v878_v2, %v848_v3  ;;  %v1368_v7 = vpop.f32.mrb[14].mxu0  ;;  %v712_v9 = vpop.f32.mrb[15].mxu1  ;;  %917 = sbr.rel (%p1183_p0) target bundleno = 444 (0x1bc), region = 90  ;;  %v927_v35 = vld [vmem:[#allocation2 + $0x48] sm:$0xff] (!%p1183_p0)  ;;  %v963_v45 = vmax.f32 (!%p1183_p0), %v947_v33, 0.0 }
 0x1aa   : > { %911 = vst [vmem:[#allocation2 + $0x68] sm:$0xff] %v895_v4  ;;  %v863_v10 = vadd.f32 %v1368_v7, %v1312_v5  ;;  %v857_v11 = vpop.f32.mrb[15].mxu0  ;;  %v926_v34 = vld [vmem:[#allocation2 + $0x40] sm:$0xff] (!%p1183_p0)  ;;  %v950_v47 = vadd.f32 (!%p1183_p0), %v1184_v17, %v927_v35  ;;  %980 = vst [vmem:[%s2084_s4 + $0x38] sm:$0xff] (!%p1183_p0), %v964_v50 }
 0x1ab   : > { %910 = vst [vmem:[#allocation2 + $0x60] sm:$0xff] %v894_v6  ;;  %v858_v13 = vadd.f32 %v857_v11, %v712_v9  ;;  %v949_v46 = vadd.f32 (!%p1183_p0), %v1184_v17, %v926_v34  ;;  %979 = vst [vmem:[%s2084_s4 + $0x30] sm:$0xff] (!%p1183_p0), %v963_v45 }
 0x1ac   : > { %v897_v14 = vadd.f32 %v881_v8, %v863_v10  ;;  %v966_v55 = vmax.f32 (!%p1183_p0), %v950_v47, 0.0 }
 0x1ad   : > { %v896_v15 = vadd.f32 %v880_v12, %v858_v13  ;;  %v929_v41 = vld [vmem:[#allocation2 + $0x58] sm:$0xff] (!%p1183_p0)  ;;  %v965_v54 = vmax.f32 (!%p1183_p0), %v949_v46, 0.0 }
 0x1ae   : > { %913 = vst [vmem:[#allocation2 + $0x78] sm:$0xff] %v897_v14  ;;  %v928_v36 = vld [vmem:[#allocation2 + $0x50] sm:$0xff] (!%p1183_p0)  ;;  %v952_v52 = vadd.f32 (!%p1183_p0), %v1184_v17, %v929_v41  ;;  %982 = vst [vmem:[%s2084_s4 + $0x48] sm:$0xff] (!%p1183_p0), %v966_v55 }
 0x1af   : > { %912 = vst [vmem:[#allocation2 + $0x70] sm:$0xff] %v896_v15  ;;  %v951_v51 = vadd.f32 (!%p1183_p0), %v1184_v17, %v928_v36  ;;  %981 = vst [vmem:[%s2084_s4 + $0x40] sm:$0xff] (!%p1183_p0), %v965_v54 }
 0x1b0   : > { %v968_v59 = vmax.f32 %v952_v52, 0.0 }
 0x1b1   : > { %v931_v43 = vld [vmem:[#allocation2 + $0x68] sm:$0xff]  ;;  %v967_v58 = vmax.f32 %v951_v51, 0.0 }
 0x1b2   : > { %v930_v42 = vld [vmem:[#allocation2 + $0x60] sm:$0xff]  ;;  %v954_v56 = vadd.f32 %v1184_v17, %v931_v43  ;;  %984 = vst [vmem:[%s2084_s4 + $0x58] sm:$0xff] %v968_v59 }
 0x1b3   : > { %v953_v53 = vadd.f32 %v1184_v17, %v930_v42  ;;  %983 = vst [vmem:[%s2084_s4 + $0x50] sm:$0xff] %v967_v58 }
 0x1b4   : > { %v970_v62 = vmax.f32 %v954_v56, 0.0 }
 0x1b5   : > { %v933_v49 = vld [vmem:[#allocation2 + $0x78] sm:$0xff]  ;;  %v969_v60 = vmax.f32 %v953_v53, 0.0 }
 0x1b6   : > { %v932_v48 = vld [vmem:[#allocation2 + $0x70] sm:$0xff]  ;;  %v956_v61 = vadd.f32 %v1184_v17, %v933_v49  ;;  %986 = vst [vmem:[%s2084_s4 + $0x68] sm:$0xff] %v970_v62 }
 0x1b7   : > { %v955_v57 = vadd.f32 %v1184_v17, %v932_v48  ;;  %985 = vst [vmem:[%s2084_s4 + $0x60] sm:$0xff] %v969_v60 }
 0x1b8   : > { %v972_v0 = vmax.f32 %v956_v61, 0.0 }
 0x1b9   : > { %v971_v63 = vmax.f32 %v955_v57, 0.0 }
 0x1ba   : > { %988 = vst [vmem:[%s2084_s4 + $0x78] sm:$0xff] %v972_v0 }
 0x1bb   : > { %987 = vst [vmem:[%s2084_s4 + $0x70] sm:$0xff] %v971_v63 }
 0x1bc PF: > { %s1192_s23 = sshll.u32 %s1747_s24, 11  ;;  %s2319_s15 = sld [smem:[#allocation28_spill]] }
 0x1bd   : > { %s1003_s27 = sshll.u32 %s2084_s4, 4  ;;  %s2195_s0 = scalar_lea.sflag [#allocation5], %s462_s6  ;;  %s2191_s27 = int_to_ptr.vmem [resolvable:$true] %s1003_s27 }
 0x1be   : > { %s1617_s8 = scalar_lea.vmem %s2191_s27, 2048  ;;  %p2321_p4 = scmp.ne.s32.totalorder %s2307_s12, 0 }
 0x1bf   : > { %p1618_p1 = scmp.ne.s32.totalorder %s2191_s27, %s1617_s8  ;;  %s1769_s24 = smov [#allocation9]  }
 0x1c0   : > { %s1621_s14 = sshll.u32 %s1769_s24, 4  ;;  %s1622_s14 = int_to_ptr.vmem [resolvable:$false] %s1621_s14 }
 0x1c1   : > { %p1619_p5 = pnand %p1618_p1, %p2321_p4  ;;  %s1623_s20 = scalar_lea.vmem %s1622_s14, 4096 }
 0x1c2   : > { %s2320_s11 = smov %s2319_s15  ;;  %s2188_s7 = scalar_lea.hbm %s2319_s15, %s1192_s23 }
 0x1c3   : > { %p1620_p2 = pneg %p1619_p5  ;;  %p1624_p10 = scmp.lt.s32.totalorder %s2191_s27, %s1622_s14 }
 0x1c4   : > { %p1625_p13 = scmp.lt.s32.totalorder %s1623_s20, %s1617_s8 }
 0x1c6   : > { %p1626_p3 = por %p1625_p13, %p1624_p10 }
 0x1c8   : > { %p1627_p6 = pnand %p1626_p3, %p1620_p2 }
 0x1ca   : > { %1630 = shalt.err (!%p1627_p6)
}
 0x1cb   : > { %s1631_s29 = scalar_lea.hbm %s2188_s7, 2048  ;;  %s1635_s6 = scalar_lea.hbm %s2320_s11, 8192 }
 0x1cc   : > { %p1632_p8 = scmp.ne.s32.totalorder %s2188_s7, %s1631_s29  ;;  %p1636_p9 = scmp.lt.u32.totalorder %s2188_s7, %s2320_s11 }
 0x1cd   : > { %p1637_p11 = scmp.lt.u32.totalorder %s1635_s6, %s1631_s29  ;;  %p1639_p1 = scmp.lt.u32.totalorder %s1631_s29, %s2188_s7 }
 0x1ce   : > { %p1633_p12 = pnand %p1632_p8, %p2321_p4 }
 0x1cf   : > { %p1638_p0 = por %p1637_p11, %p1636_p9 }
 0x1d0   : > { %p1634_p7 = pneg %p1633_p12 }
 0x1d1   : > { %p1640_p5 = por %p1639_p1, %p1638_p0 }
 0x1d3   : > { %p1641_p2 = pnand %p1640_p5, %p1634_p7 }
 0x1d5   : > { %1644 = shalt.err (!%p1641_p2)
}
 0x1d6   : > { %s1770_s10 = smov 128   ;;  %s1771_s5 = smov 8  }
 0x1d7   : > { %1462 = dma.vmem_to_hbm [thread:$0]  (%p2321_p4), %s2191_s27, 2048, %s2188_s7, %s2195_s0, %s1770_s10, %s1770_s10, %s1771_s5  }
 0x1d8 PF: > { %s2322_s18 = sld [smem:[#allocation19_spill]]  ;;  %s2323_s17 = sld [smem:[#allocation16_spill]] }
 0x1d9   : > { %s2324_s4 = sld [smem:[#allocation25_spill]] }
 0x1de   : > { %p1474_p10 = scmp.ge.s32.totalorder %s2322_s18, 2  ;;  %s1018_s23 = sand.u32 1, %s2323_s17  }
 0x1df   : > { %p2325_p13 = scmp.ne.s32.totalorder %s2324_s4, 0  ;;  %s1019_s9 = scalar_lea.sflag [#allocation5], %s1018_s23 }
 0x1e1   : > { %p1469_p3 = pnand %p1474_p10, %p2325_p13 }
 0x1e3   : > { %1706 = dma.done.wait (!%p1469_p3), %s1019_s9, 2048  }
 0x1e4   : > { %1708 = vsyncadd (!%p1469_p3), %s1019_s9, 4294965248  ;;  %s21_s27 = sadd.s32 1, %s2322_s18   ;;  %s2327_s12 = sld [smem:[#allocation17_spill]] }
 0x1e5   : > { %p2224_p6 = scmp.ge.s32.totalorder %s21_s27, 18   ;;  %s2328_s17 = sld [smem:[#allocation24_spill]] }
 0x1e6   : > { %s2329_s7 = sld [smem:[#allocation22_spill]]  ;;  %s2330_s0 = sld [smem:[#allocation23_spill]] }
 0x1e7   : > { %s2331_s24 = sld [smem:[#allocation18_spill]]  ;;  %s2332_s8 = sld [smem:[#allocation20_spill]] }
 0x1e8   : > { %s2333_s14 = sld [smem:[#allocation21_spill]]  ;;  %s2335_s15 = smov %s1715_s16 }
 0x1e9   : > { %s2337_s18 = smov %s1727_s19  ;;  %s2339_s20 = smov %s1735_s21 }
 0x1ea   : > { %s2336_s16 = smov %s2327_s12  ;;  %s2340_s21 = smov %s1739_s22 }
 0x1eb   : > { %s2342_s23 = smov %s1751_s25  ;;  %20 = sbr.rel (!%p2224_p6) target bundleno = 15 (0xf), region = 149 }
 0x1ec   : > { %s2338_s19 = smov %s2329_s7  ;;  %s2341_s22 = smov %s2330_s0 }
 0x1ed   : > { %s2343_s25 = smov %s2332_s8 }
 0x1ee   : > { %s2344_s26 = smov %s2333_s14 }
 0x1f2   :  { %1024 = vsyncpa [#allocation4], 1 }
 0x1f3   :  { %1026 = vsyncpa [#allocation4 + $0x1], 1 }
 0x1f4   :  { %1027 = vsyncpa [#allocation8], 1 }
 0x1f5   :  { %1028 = vsyncpa [#allocation5], 1 }
 0x1f6   :  { %1030 = vsyncpa [#allocation5 + $0x1], 1 }

// kernel: rgcn_forward.2
= control target key start
LH: loop header
LB: loop body
LE: loop exit
PB: predicated region body
PF: predicated region fallthrough
CT: control target
= control target key end

     0   :  { %9 = vsyncpa [#allocation3], 0  ;;  %s2253_s0 = inlined_call_operand.hbm [shape: f32[512,128], index: 0, kind: input, shape index: {}]   ;;  %s2254_s1 = inlined_call_operand.vmem [shape: f32[128,384], index: 1, kind: input, shape index: {}]   ;;  %s2255_s2 = inlined_call_operand.vmem [shape: f32[2,512,128], index: 2, kind: output, shape index: {0}]   ;;  %s2256_s3 = inlined_call_operand.vmem [shape: f32[512,128], index: 3, kind: output, shape index: {1}]  }
   0x1   :  { %11 = vsyncpa [#allocation3 + $0x1], 0  ;;  %s1640_s12 = smov 0   ;;  %s1642_s13 = smov 0  }
   0x2   :  { %s1644_s14 = smov 0   ;;  %s1646_s15 = smov 0  }
   0x3 LB: > { %s1659_s16 = sadd.s32 4294967295, %s1614_s15   ;;  %s1662_s17 = sadd.s32 1, %s1614_s15   ;;  %s1614_s15 = sphi %s1646_s15, %s2266_s15   ;;  %s1610_s14 = sphi %s1644_s14, %s2265_s14   ;;  %s1606_s13 = sphi %s1642_s13, %s2264_s13   ;;  %s1602_s12 = sphi %s1640_s12, %s2263_s12  }
   0x4   : > { %s21_s18 = ssub.s32 %s1614_s15, %s1662_s17  ;;  %s24_s19 = sadd.s32 1, %s1610_s14 }
   0x5   : > { %p22_p0 = scmp.eq.s32.totalorder %s21_s18, 0  ;;  %p31_p1 = scmp.ne.s32.totalorder %s1610_s14, %s1606_s13 }
   0x6   : > { %p32_p2 = scmp.eq.s32.totalorder %s1614_s15, 0  ;;  %p37_p3 = scmp.ne.s32.totalorder %s1606_s13, %s1602_s12 }
   0x7   : > { %s1672_s20 = scalar_select %p22_p0, %s1610_s14, %s24_s19  }
   0x8   : > { %p1674_p4 = por %p32_p2, %p31_p1  ;;  %p38_p5 = scmp.eq.s32.totalorder %s1659_s16, 0 }
   0x9   : > { %p82_p6 = scmp.eq.s32.totalorder %s1659_s16, 1  ;;  %p1514_p8 = scmp.lt.s32.totalorder %s1614_s15, 2 }
   0xa   : > { %p1680_p7 = por %p38_p5, %p37_p3  ;;  %s137_s24 = sand.u32 1, %s1610_s14  }
   0xb   : > { %p1685_p9 = por %p82_p6, %p31_p1  ;;  %s1253_s25 = sshll.u32 %s137_s24, 8 }
   0xc   : > { %s1298_s26 = sshll.u32 %s1614_s15, 12  ;;  %s141_s30 = scalar_lea.vmem [#allocation2], %s1253_s25 }
   0xd   : > { %s2259_s23 = scalar_select %p1685_p9, 1, 0 }
   0xe   : > { %s1694_s29 = scalar_lea.hbm %s2253_s0, %s1298_s26  ;;  %s148_s4 = sshll.u32 %s141_s30, 4  ;;  %s1696_s4 = int_to_ptr.vmem [resolvable:$true] %s148_s4 }
   0xf   : > { %p1700_p10 = pnand %p1514_p8, %p1674_p4  ;;  %s1705_s6 = scalar_lea.sflag [#allocation3], %s137_s24 }
  0x10   : > { %s1550_s7 = scalar_lea.hbm %s1694_s29, 4096  ;;  %s1555_s10 = scalar_lea.hbm %s2253_s0, 8192 }
  0x11   : > { %p1551_p12 = scmp.ne.s32.totalorder %s1694_s29, %s1550_s7  ;;  %p1552_p13 = pneg %p1700_p10 }
  0x12   : > { %p1556_p2 = scmp.lt.u32.totalorder %s1694_s29, %s2253_s0  ;;  %p1557_p3 = scmp.lt.u32.totalorder %s1555_s10, %s1550_s7 }
  0x13   : > { %p1553_p0 = pnand %p1552_p13, %p1551_p12  ;;  %p1559_p5 = scmp.lt.u32.totalorder %s1550_s7, %s1694_s29 }
  0x14   : > { %p1558_p4 = por %p1557_p3, %p1556_p2 }
  0x15   : > { %p1554_p1 = pneg %p1553_p0 }
  0x16   : > { %p1560_p6 = por %p1559_p5, %p1558_p4 }
  0x18   : > { %p1561_p8 = pnand %p1560_p6, %p1554_p1 }
  0x1a   : > { %1564 = shalt.err (!%p1561_p8)
}
  0x1b   : > { %s1565_s18 = scalar_lea.vmem %s1696_s4, 4096  ;;  %s1616_s19 = smov [#allocation2]  }
  0x1c   : > { %p1566_p12 = scmp.ne.s32.totalorder %s1696_s4, %s1565_s18  ;;  %s1570_s21 = sshll.u32 %s1616_s19, 4  ;;  %s1571_s21 = int_to_ptr.vmem [resolvable:$false] %s1570_s21 }
  0x1d   : > { %s1572_s24 = scalar_lea.vmem %s1571_s21, 8192  ;;  %p1573_p9 = scmp.lt.s32.totalorder %s1696_s4, %s1571_s21 }
  0x1e   : > { %p1568_p0 = pnand %p1566_p12, %p1552_p13  ;;  %p1574_p2 = scmp.lt.s32.totalorder %s1572_s24, %s1565_s18 }
  0x20   : > { %p1569_p11 = pneg %p1568_p0  ;;  %p1575_p3 = por %p1574_p2, %p1573_p9 }
  0x22   : > { %p1576_p4 = pnand %p1575_p3, %p1569_p11 }
  0x24   : > { %1579 = shalt.err (!%p1576_p4)
}
  0x25   : > { %s1617_s25 = smov 128   ;;  %s1618_s26 = smov 8  }
  0x26   : > { %1513 = dma.hbm_to_vmem [thread:$0]  (!%p1700_p10), %s1694_s29, 4096, %s1696_s4, %s1705_s6, %s1617_s25, %s1617_s25, %s1618_s26  }
  0x27   : > { %p156_p13 = scmp.lt.s32.totalorder %s1614_s15, 3  ;;  %p2261_p1 = scmp.ge.s32.totalorder %s1614_s15, 1 }
  0x29   : > { %p157_p5 = pnand %p2261_p1, %p156_p13 }
  0x2a   : > { %s1737_s27 = sand.u32 (!%p157_p5), 1, %s1606_s13  }
  0x2b   : > { %160 = sbr.rel (%p157_p5) target bundleno = 400 (0x190), region = 28  ;;  %s1257_s28 = sshll.u32 (!%p157_p5), %s1737_s27, 8 }
  0x2c   : > { %s163_s30 = scalar_lea.sflag (!%p157_p5), [#allocation3], %s1737_s27  ;;  %s1741_s7 = scalar_lea.vmem (!%p157_p5), [#allocation2], %s1257_s28 }
  0x32   : > { %1597 = dma.done.wait (%p1680_p7), %s163_s30, 4096  }
  0x33   : > { %1599 = vsyncadd (%p1680_p7), %s163_s30, 4294963200  ;;  %v1619_v0 = vmov 0.0   ;;  %v234_v1 = vld [vmem:[%s2254_s1 + $0x8] sm:$0xff]  ;;  %v237_v2 = vld [vmem:[%s2254_s1 + $0x20] sm:$0xff]  ;;  %p2262_p9 = scmp.ne.s32.totalorder %s2259_s23, 0 }
  0x34   : > { %345 = vmatprep.mubr.f32.mxu0 %v1619_v0  ;;  %489 = vmatprep.mubr.f32.mxu1 %v1619_v0  ;;  %v233_v3 = vld [vmem:[%s2254_s1] sm:$0xff]  ;;  %v1428_v4 = vpack.c.bf16 %v237_v2, %v234_v1  ;;  %v236_v5 = vld [vmem:[%s2254_s1 + $0x18] sm:$0xff]  ;;  %v243_v7 = vld [vmem:[%s2254_s1 + $0x50] sm:$0xff]  ;;  %s1299_s22 = sshll.u32 (%p2262_p9), %s1659_s16, 8 }
  0x35   : > { %v240_v6 = vld [vmem:[%s2254_s1 + $0x38] sm:$0xff]  ;;  %v1430_v8 = vpack.c.bf16 %v236_v5, %v233_v3  ;;  %v239_v10 = vld [vmem:[%s2254_s1 + $0x30] sm:$0xff]  ;;  %v242_v11 = vld [vmem:[%s2254_s1 + $0x48] sm:$0xff]  ;;  %s2113_s11 = scalar_lea.vmem (%p2262_p9), %s2255_s2, %s1299_s22 }
  0x36   : > { %v1432_v9 = vpack.c.bf16 %v243_v7, %v240_v6  ;;  %v246_v12 = vld [vmem:[%s2254_s1 + $0x68] sm:$0xff]  ;;  %1429 = vmatprep.subr.bf16.mxu0 %v1428_v4  ;;  %1492 = vmatprep.subr.bf16.mxu1 %v1428_v4  ;;  %v249_v13 = vld [vmem:[%s2254_s1 + $0x80] sm:$0xff]  ;;  %v1434_v14 = vpack.c.bf16 %v242_v11, %v239_v10  ;;  %v248_v17 = vld [vmem:[%s2254_s1 + $0x78] sm:$0xff] }
  0x37   : > { %1431 = vmatpush1.bf16.msra.mxu0 %v1430_v8  ;;  %1500 = vmatpush1.bf16.msra.mxu1 %v1430_v8  ;;  %v1436_v15 = vpack.c.bf16 %v249_v13, %v246_v12  ;;  %v245_v16 = vld [vmem:[%s2254_s1 + $0x60] sm:$0xff]  ;;  %v252_v18 = vld [vmem:[%s2254_s1 + $0x98] sm:$0xff]  ;;  %v255_v19 = vld [vmem:[%s2254_s1 + $0xb0] sm:$0xff] }
  0x38   : > { %1433 = vmatprep.subr.bf16.mxu0 %v1432_v9  ;;  %1493 = vmatprep.subr.bf16.mxu1 %v1432_v9  ;;  %v1438_v20 = vpack.c.bf16 %v248_v17, %v245_v16  ;;  %v1440_v21 = vpack.c.bf16 %v255_v19, %v252_v18  ;;  %v251_v22 = vld [vmem:[%s2254_s1 + $0x90] sm:$0xff]  ;;  %v254_v23 = vld [vmem:[%s2254_s1 + $0xa8] sm:$0xff]  ;;  %v261_v25 = vld [vmem:[%s2254_s1 + $0xe0] sm:$0xff] }
  0x39   : > { %v258_v24 = vld [vmem:[%s2254_s1 + $0xc8] sm:$0xff]  ;;  %v1442_v26 = vpack.c.bf16 %v254_v23, %v251_v22  ;;  %v257_v28 = vld [vmem:[%s2254_s1 + $0xc0] sm:$0xff]  ;;  %v260_v29 = vld [vmem:[%s2254_s1 + $0xd8] sm:$0xff] }
  0x3a   : > { %v1444_v27 = vpack.c.bf16 %v261_v25, %v258_v24  ;;  %v264_v30 = vld [vmem:[%s2254_s1 + $0xf8] sm:$0xff]  ;;  %v267_v31 = vld [vmem:[%s2254_s1 + $0x110] sm:$0xff]  ;;  %v1446_v32 = vpack.c.bf16 %v260_v29, %v257_v28  ;;  %v266_v35 = vld [vmem:[%s2254_s1 + $0x108] sm:$0xff] }
  0x3b   : > { %1435 = vmatpush1.bf16.msra.mxu0 %v1434_v14  ;;  %1501 = vmatpush1.bf16.msra.mxu1 %v1434_v14  ;;  %v1448_v33 = vpack.c.bf16 %v267_v31, %v264_v30  ;;  %v263_v34 = vld [vmem:[%s2254_s1 + $0xf0] sm:$0xff]  ;;  %v270_v36 = vld [vmem:[%s2254_s1 + $0x128] sm:$0xff]  ;;  %v273_v37 = vld [vmem:[%s2254_s1 + $0x140] sm:$0xff] }
  0x3c   : > { %1437 = vmatprep.subr.bf16.mxu0 %v1436_v15  ;;  %1494 = vmatprep.subr.bf16.mxu1 %v1436_v15  ;;  %v1450_v38 = vpack.c.bf16 %v266_v35, %v263_v34  ;;  %v1452_v39 = vpack.c.bf16 %v273_v37, %v270_v36  ;;  %v269_v40 = vld [vmem:[%s2254_s1 + $0x120] sm:$0xff]  ;;  %v272_v41 = vld [vmem:[%s2254_s1 + $0x138] sm:$0xff]  ;;  %v279_v43 = vld [vmem:[%s2254_s1 + $0x170] sm:$0xff] }
  0x3d   : > { %v276_v42 = vld [vmem:[%s2254_s1 + $0x158] sm:$0xff]  ;;  %v1454_v44 = vpack.c.bf16 %v272_v41, %v269_v40  ;;  %v275_v46 = vld [vmem:[%s2254_s1 + $0x150] sm:$0xff]  ;;  %v278_v47 = vld [vmem:[%s2254_s1 + $0x168] sm:$0xff] }
  0x3e   : > { %v1456_v45 = vpack.c.bf16 %v279_v43, %v276_v42  ;;  %v235_v48 = vld [vmem:[%s2254_s1 + $0x10] sm:$0xff]  ;;  %v238_v49 = vld [vmem:[%s2254_s1 + $0x28] sm:$0xff]  ;;  %v1458_v50 = vpack.c.bf16 %v278_v47, %v275_v46  ;;  %v241_v52 = vld [vmem:[%s2254_s1 + $0x40] sm:$0xff] }
  0x3f   : > { %1439 = vmatpush1.bf16.msra.mxu0 %v1438_v20  ;;  %1502 = vmatpush1.bf16.msra.mxu1 %v1438_v20  ;;  %v1460_v51 = vpack.c.bf16 %v238_v49, %v235_v48  ;;  %v244_v53 = vld [vmem:[%s2254_s1 + $0x58] sm:$0xff]  ;;  %v1858_v54 = vld [vmem:[%s1741_s7] sm:$0xff]  ;;  %v247_v57 = vld [vmem:[%s2254_s1 + $0x70] sm:$0xff] }
  0x40   : > { %1441 = vmatprep.subr.bf16.mxu0 %v1440_v21  ;;  %1495 = vmatprep.subr.bf16.mxu1 %v1440_v21  ;;  %v1861_v55 = vld [vmem:[%s1741_s7 + $0xc0] sm:$0xff]  ;;  %v1464_v56 = vpack.c.bf16 %v244_v53, %v241_v52  ;;  %v250_v58 = vld [vmem:[%s2254_s1 + $0x88] sm:$0xff]  ;;  %v256_v63 = vld [vmem:[%s2254_s1 + $0xb8] sm:$0xff] }
  0x41   : > { %v1873_v59 = vld [vmem:[%s1741_s7 + $0x8] sm:$0xff]  ;;  %v1468_v61 = vpack.c.bf16 %v250_v58, %v247_v57  ;;  %v253_v62 = vld [vmem:[%s2254_s1 + $0xa0] sm:$0xff]  ;;  %v1889_v1 = vld [vmem:[%s1741_s7 + $0x10] sm:$0xff] }
  0x42   : > { %v1876_v60 = vld [vmem:[%s1741_s7 + $0xc8] sm:$0xff]  ;;  %v1892_v2 = vld [vmem:[%s1741_s7 + $0xd0] sm:$0xff]  ;;  %v1472_v3 = vpack.c.bf16 %v256_v63, %v253_v62  ;;  %v204_v6 = vld [vmem:[%s1741_s7 + $0x18] sm:$0xff] }
  0x43   : > { %1443 = vmatpush1.bf16.msra.mxu0 %v1442_v26  ;;  %1503 = vmatpush1.bf16.msra.mxu1 %v1442_v26  ;;  %v259_v4 = vld [vmem:[%s2254_s1 + $0xd0] sm:$0xff]  ;;  %v262_v5 = vld [vmem:[%s2254_s1 + $0xe8] sm:$0xff]  ;;  %v1906_v7 = vld [vmem:[%s1741_s7 + $0xd8] sm:$0xff] }
  0x44   : > { %1445 = vmatprep.subr.bf16.mxu0 %v1444_v27  ;;  %1496 = vmatprep.subr.bf16.mxu1 %v1444_v27  ;;  %v1476_v8 = vpack.c.bf16 %v262_v5, %v259_v4  ;;  %v265_v9 = vld [vmem:[%s2254_s1 + $0x100] sm:$0xff]  ;;  %v268_v10 = vld [vmem:[%s2254_s1 + $0x118] sm:$0xff]  ;;  %v271_v14 = vld [vmem:[%s2254_s1 + $0x130] sm:$0xff] }
  0x45   : > { %v205_v11 = vld [vmem:[%s1741_s7 + $0x20] sm:$0xff]  ;;  %v1480_v13 = vpack.c.bf16 %v268_v10, %v265_v9  ;;  %v274_v15 = vld [vmem:[%s2254_s1 + $0x148] sm:$0xff]  ;;  %v280_v20 = vld [vmem:[%s2254_s1 + $0x178] sm:$0xff] }
  0x46   : > { %v1919_v12 = vld [vmem:[%s1741_s7 + $0xe0] sm:$0xff]  ;;  %v206_v16 = vld [vmem:[%s1741_s7 + $0x28] sm:$0xff]  ;;  %v1484_v18 = vpack.c.bf16 %v274_v15, %v271_v14  ;;  %v207_v21 = vld [vmem:[%s1741_s7 + $0x30] sm:$0xff] }
  0x47   : > { %1447 = vmatpush1.bf16.msra.mxu0 %v1446_v32  ;;  %1504 = vmatpush1.bf16.msra.mxu1 %v1446_v32  ;;  %v1932_v17 = vld [vmem:[%s1741_s7 + $0xe8] sm:$0xff]  ;;  %v277_v19 = vld [vmem:[%s2254_s1 + $0x160] sm:$0xff]  ;;  %v1945_v22 = vld [vmem:[%s1741_s7 + $0xf0] sm:$0xff] }
  0x48   : > { %1449 = vmatprep.subr.bf16.mxu0 %v1448_v33  ;;  %1497 = vmatprep.subr.bf16.mxu1 %v1448_v33  ;;  %v1488_v23 = vpack.c.bf16 %v280_v20, %v277_v19  ;;  %v208_v24 = vld [vmem:[%s1741_s7 + $0x38] sm:$0xff]  ;;  %v209_v26 = vld [vmem:[%s1741_s7 + $0x40] sm:$0xff]  ;;  %v210_v27 = vld [vmem:[%s1741_s7 + $0x48] sm:$0xff] }
  0x49   : > { %v1952_v25 = vld [vmem:[%s1741_s7 + $0xf8] sm:$0xff]  ;;  %v211_v28 = vld [vmem:[%s1741_s7 + $0x50] sm:$0xff]  ;;  %v213_v30 = vld [vmem:[%s1741_s7 + $0x60] sm:$0xff] }
  0x4a   : > { %v212_v29 = vld [vmem:[%s1741_s7 + $0x58] sm:$0xff]  ;;  %v214_v31 = vld [vmem:[%s1741_s7 + $0x68] sm:$0xff]  ;;  %v215_v32 = vld [vmem:[%s1741_s7 + $0x70] sm:$0xff] }
  0x4b   : > { %1451 = vmatpush1.bf16.msra.mxu0 %v1450_v38  ;;  %1505 = vmatpush1.bf16.msra.mxu1 %v1450_v38  ;;  %v216_v33 = vld [vmem:[%s1741_s7 + $0x78] sm:$0xff]  ;;  %v217_v34 = vld [vmem:[%s1741_s7 + $0x80] sm:$0xff]  ;;  %v218_v35 = vld [vmem:[%s1741_s7 + $0x88] sm:$0xff] }
  0x4c   : > { %1453 = vmatprep.subr.bf16.mxu0 %v1452_v39  ;;  %1498 = vmatprep.subr.bf16.mxu1 %v1452_v39  ;;  %v219_v36 = vld [vmem:[%s1741_s7 + $0x90] sm:$0xff]  ;;  %v220_v37 = vld [vmem:[%s1741_s7 + $0x98] sm:$0xff]  ;;  %v221_v38 = vld [vmem:[%s1741_s7 + $0xa0] sm:$0xff] }
  0x4d   : > { %v222_v39 = vld [vmem:[%s1741_s7 + $0xa8] sm:$0xff]  ;;  %v223_v40 = vld [vmem:[%s1741_s7 + $0xb0] sm:$0xff]  ;;  %v224_v41 = vld [vmem:[%s1741_s7 + $0xb8] sm:$0xff]  ;;  %s1258_s7 = sshll.u32 %s1737_s27, 9  ;;  %s1259_s27 = sshll.u32 %s1659_s16, 5 }
  0x4e   : > { %s2000_s29 = scalar_lea.vmem [#allocation4], %s1258_s7  ;;  %p196_p7 = scmp.lt.s32.totalorder %s1259_s27, 63 }
  0x4f   : > { %1455 = vmatpush1.bf16.msra.mxu0 %v1454_v44  ;;  %1506 = vmatpush1.bf16.msra.mxu1 %v1454_v44 }
  0x50   : > { %1457 = vmatprep.subr.bf16.mxu0 %v1456_v45  ;;  %1499 = vmatprep.subr.bf16.mxu1 %v1456_v45  ;;  %s2268_s27 = smov (!%p196_p7, %s1259_s27), 63 }
  0x51   : > { %s1260_s4 = sshll.u32 %s2268_s27, 3 }
  0x52   : > { %s2038_s8 = scalar_lea.vmem %s2256_s3, %s1260_s4 }
  0x53   : > { %1459 = vmatpush1.bf16.msra.mxu0 %v1458_v50  ;;  %1507 = vmatpush1.bf16.msra.mxu1 %v1458_v50 }
  0x54   : > { %1461 = vmatprep.subr.bf16.mxu1 %v1460_v51 }
  0x56   : > { %346 = vmatmul.mubr.f32.vlgmr.msra.gmra.mrb[0].mxu0 %v1858_v54  ;;  %490 = vmatmul.mubr.f32.vlgmr.msra.gmra.mrb[0].mxu1 %v1861_v55 }
  0x57   : > { %1463 = vmatpush3.bf16.msra.mxu1 %v1460_v51  ;;  %351 = vmatprep.mubr.f32.mxu0 %v1619_v0 }
  0x58   : > { %495 = vmatprep.mubr.f32.mxu1 %v1619_v0  ;;  %1465 = vmatprep.subr.bf16.mxu1 %v1464_v56 }
  0x5a   : > { %352 = vmatmul.mubr.f32.gmra.mrb[2].mxu0 %v1873_v59  ;;  %496 = vmatmul.mubr.f32.gmra.mrb[2].mxu1 %v1876_v60 }
  0x5b   : > { %1467 = vmatpush3.bf16.msra.mxu1 %v1464_v56  ;;  %357 = vmatprep.mubr.f32.mxu0 %v1619_v0 }
  0x5c   : > { %501 = vmatprep.mubr.f32.mxu1 %v1619_v0  ;;  %1469 = vmatprep.subr.bf16.mxu1 %v1468_v61 }
  0x5e   : > { %358 = vmatmul.mubr.f32.gmra.mrb[4].mxu0 %v1889_v1  ;;  %502 = vmatmul.mubr.f32.gmra.mrb[4].mxu1 %v1892_v2 }
  0x5f   : > { %1471 = vmatpush3.bf16.msra.mxu1 %v1468_v61  ;;  %363 = vmatprep.mubr.f32.mxu0 %v1619_v0 }
  0x60   : > { %507 = vmatprep.mubr.f32.mxu1 %v1619_v0  ;;  %1473 = vmatprep.subr.bf16.mxu1 %v1472_v3 }
  0x62   : > { %364 = vmatmul.mubr.f32.gmra.mrb[6].mxu0 %v204_v6  ;;  %508 = vmatmul.mubr.f32.gmra.mrb[6].mxu1 %v1906_v7 }
  0x63   : > { %1475 = vmatpush3.bf16.msra.mxu1 %v1472_v3  ;;  %369 = vmatprep.mubr.f32.mxu0 %v1619_v0 }
  0x64   : > { %513 = vmatprep.mubr.f32.mxu1 %v1619_v0  ;;  %1477 = vmatprep.subr.bf16.mxu1 %v1476_v8 }
  0x66   : > { %370 = vmatmul.mubr.f32.gmra.mrb[8].mxu0 %v205_v11  ;;  %514 = vmatmul.mubr.f32.gmra.mrb[8].mxu1 %v1919_v12 }
  0x67   : > { %1479 = vmatpush3.bf16.msra.mxu1 %v1476_v8  ;;  %375 = vmatprep.mubr.f32.mxu0 %v1619_v0 }
  0x68   : > { %519 = vmatprep.mubr.f32.mxu1 %v1619_v0  ;;  %1481 = vmatprep.subr.bf16.mxu1 %v1480_v13 }
  0x6a   : > { %376 = vmatmul.mubr.f32.gmra.mrb[10].mxu0 %v206_v16  ;;  %520 = vmatmul.mubr.f32.gmra.mrb[10].mxu1 %v1932_v17 }
  0x6b   : > { %1483 = vmatpush3.bf16.msra.mxu1 %v1480_v13  ;;  %381 = vmatprep.mubr.f32.mxu0 %v1619_v0 }
  0x6c   : > { %525 = vmatprep.mubr.f32.mxu1 %v1619_v0  ;;  %1485 = vmatprep.subr.bf16.mxu1 %v1484_v18 }
  0x6e   : > { %382 = vmatmul.mubr.f32.gmra.mrb[12].mxu0 %v207_v21  ;;  %526 = vmatmul.mubr.f32.gmra.mrb[12].mxu1 %v1945_v22 }
  0x6f   : > { %1487 = vmatpush3.bf16.msra.mxu1 %v1484_v18  ;;  %387 = vmatprep.mubr.f32.mxu0 %v1619_v0 }
  0x70   : > { %531 = vmatprep.mubr.f32.mxu1 %v1619_v0  ;;  %1489 = vmatprep.subr.bf16.mxu1 %v1488_v23 }
  0x72   : > { %388 = vmatmul.mubr.f32.gmra.mrb[14].mxu0 %v208_v24  ;;  %532 = vmatmul.mubr.f32.gmra.mrb[14].mxu1 %v1952_v25 }
  0x73   : > { %1491 = vmatpush3.bf16.msra.mxu1 %v1488_v23  ;;  %393 = vmatprep.mubr.f32.mxu0 %v1619_v0 }
  0x74   : > { %1380 = vmatprep.mubr.f32.mxu1 %v1858_v54 }
  0x76   : > { %394 = vmatmul.mubr.f32.gmra.mrb[16].mxu0 %v209_v26  ;;  %1381 = vmatmul.mubr.f32.vlgmr.msra.gmra.mrb[16].mxu1 %v1873_v59 }
  0x77   : > { %399 = vmatprep.mubr.f32.mxu0 %v1619_v0  ;;  %1383 = vmatprep.mubr.f32.mxu1 %v1889_v1 }
  0x7a   : > { %400 = vmatmul.mubr.f32.gmra.mrb[18].mxu0 %v210_v27  ;;  %1384 = vmatmul.mubr.f32.gmra.mrb[18].mxu1 %v204_v6 }
  0x7b   : > { %405 = vmatprep.mubr.f32.mxu0 %v1619_v0  ;;  %1386 = vmatprep.mubr.f32.mxu1 %v205_v11 }
  0x7e   : > { %406 = vmatmul.mubr.f32.gmra.mrb[20].mxu0 %v211_v28  ;;  %1387 = vmatmul.mubr.f32.gmra.mrb[20].mxu1 %v206_v16 }
  0x7f   : > { %411 = vmatprep.mubr.f32.mxu0 %v1619_v0  ;;  %1389 = vmatprep.mubr.f32.mxu1 %v207_v21 }
  0x82   : > { %412 = vmatmul.mubr.f32.gmra.mrb[22].mxu0 %v212_v29  ;;  %1390 = vmatmul.mubr.f32.gmra.mrb[22].mxu1 %v208_v24 }
  0x83   : > { %417 = vmatprep.mubr.f32.mxu0 %v1619_v0  ;;  %1392 = vmatprep.mubr.f32.mxu1 %v209_v26 }
  0x86   : > { %418 = vmatmul.mubr.f32.gmra.mrb[24].mxu0 %v213_v30  ;;  %1393 = vmatmul.mubr.f32.gmra.mrb[24].mxu1 %v210_v27 }
  0x87   : > { %423 = vmatprep.mubr.f32.mxu0 %v1619_v0  ;;  %1395 = vmatprep.mubr.f32.mxu1 %v211_v28 }
  0x8a   : > { %424 = vmatmul.mubr.f32.gmra.mrb[26].mxu0 %v214_v31  ;;  %1396 = vmatmul.mubr.f32.gmra.mrb[26].mxu1 %v212_v29 }
  0x8b   : > { %429 = vmatprep.mubr.f32.mxu0 %v1619_v0  ;;  %1398 = vmatprep.mubr.f32.mxu1 %v213_v30 }
  0x8e   : > { %430 = vmatmul.mubr.f32.gmra.mrb[28].mxu0 %v215_v32  ;;  %1399 = vmatmul.mubr.f32.gmra.mrb[28].mxu1 %v214_v31 }
  0x8f   : > { %435 = vmatprep.mubr.f32.mxu0 %v1619_v0  ;;  %1401 = vmatprep.mubr.f32.mxu1 %v215_v32 }
  0x92   : > { %436 = vmatmul.mubr.f32.gmra.mrb[30].mxu0 %v216_v33  ;;  %1402 = vmatmul.mubr.f32.gmra.mrb[30].mxu1 %v216_v33 }
  0x93   : > { %441 = vmatprep.mubr.f32.mxu0 %v1619_v0  ;;  %1404 = vmatprep.mubr.f32.mxu1 %v217_v34 }
  0x96   : > { %442 = vmatmul.mubr.f32.gmra.mrb[32].mxu0 %v217_v34  ;;  %1405 = vmatmul.mubr.f32.gmra.mrb[32].mxu1 %v218_v35 }
  0x97   : > { %447 = vmatprep.mubr.f32.mxu0 %v1619_v0  ;;  %1407 = vmatprep.mubr.f32.mxu1 %v219_v36 }
  0x9a   : > { %448 = vmatmul.mubr.f32.gmra.mrb[34].mxu0 %v218_v35  ;;  %1408 = vmatmul.mubr.f32.gmra.mrb[34].mxu1 %v220_v37 }
  0x9b   : > { %453 = vmatprep.mubr.f32.mxu0 %v1619_v0  ;;  %1410 = vmatprep.mubr.f32.mxu1 %v221_v38 }
  0x9e   : > { %454 = vmatmul.mubr.f32.gmra.mrb[36].mxu0 %v219_v36  ;;  %1411 = vmatmul.mubr.f32.gmra.mrb[36].mxu1 %v222_v39 }
  0x9f   : > { %459 = vmatprep.mubr.f32.mxu0 %v1619_v0  ;;  %1413 = vmatprep.mubr.f32.mxu1 %v223_v40 }
  0xa2   : > { %460 = vmatmul.mubr.f32.gmra.mrb[38].mxu0 %v220_v37  ;;  %1414 = vmatmul.mubr.f32.gmra.mrb[38].mxu1 %v224_v41 }
  0xa3   : > { %465 = vmatprep.mubr.f32.mxu0 %v1619_v0  ;;  %1416 = vmatprep.mubr.f32.mxu1 %v1861_v55 }
  0xa6   : > { %466 = vmatmul.mubr.f32.gmra.mrb[40].mxu0 %v221_v38  ;;  %1417 = vmatmul.mubr.f32.gmra.mrb[40].mxu1 %v1876_v60 }
  0xa7   : > { %471 = vmatprep.mubr.f32.mxu0 %v1619_v0  ;;  %1419 = vmatprep.mubr.f32.mxu1 %v1892_v2 }
  0xaa   : > { %472 = vmatmul.mubr.f32.gmra.mrb[42].mxu0 %v222_v39  ;;  %1420 = vmatmul.mubr.f32.gmra.mrb[42].mxu1 %v1906_v7 }
  0xab   : > { %477 = vmatprep.mubr.f32.mxu0 %v1619_v0  ;;  %1422 = vmatprep.mubr.f32.mxu1 %v1919_v12 }
  0xae   : > { %478 = vmatmul.mubr.f32.gmra.mrb[44].mxu0 %v223_v40  ;;  %1423 = vmatmul.mubr.f32.gmra.mrb[44].mxu1 %v1932_v17 }
  0xaf   : > { %483 = vmatprep.mubr.f32.mxu0 %v1619_v0  ;;  %1425 = vmatprep.mubr.f32.mxu1 %v1945_v22 }
  0xb2   : > { %484 = vmatmul.mubr.f32.gmra.mrb[46].mxu0 %v224_v41  ;;  %1426 = vmatmul.mubr.f32.gmra.mrb[46].mxu1 %v1952_v25 }
 0x129   : > { %v347_v42 = vpop.f32.mrb[0].mxu0  ;;  %v491_v43 = vpop.f32.mrb[0].mxu1 }
 0x12a   : > { %763 = vst [vmem:[%s2000_s29] sm:$0xff] %v347_v42  ;;  %787 = vst [vmem:[%s2000_s29 + $0xc0] sm:$0xff] %v491_v43  ;;  %v349_v0 = vpop.f32.mrb[1].mxu0  ;;  %v493_v44 = vpop.f32.mrb[1].mxu1 }
 0x12b   : > { %1261 = vst [vmem:[%s2000_s29 + $0x100] sm:$0xff] %v349_v0  ;;  %1285 = vst [vmem:[%s2000_s29 + $0x1c0] sm:$0xff] %v493_v44 }
 0x12d   : > { %v353_v45 = vpop.f32.mrb[2].mxu0  ;;  %v497_v46 = vpop.f32.mrb[2].mxu1 }
 0x12e   : > { %764 = vst [vmem:[%s2000_s29 + $0x8] sm:$0xff] %v353_v45  ;;  %788 = vst [vmem:[%s2000_s29 + $0xc8] sm:$0xff] %v497_v46  ;;  %v355_v47 = vpop.f32.mrb[3].mxu0  ;;  %v499_v48 = vpop.f32.mrb[3].mxu1 }
 0x12f   : > { %1262 = vst [vmem:[%s2000_s29 + $0x108] sm:$0xff] %v355_v47  ;;  %1286 = vst [vmem:[%s2000_s29 + $0x1c8] sm:$0xff] %v499_v48 }
 0x131   : > { %v359_v49 = vpop.f32.mrb[4].mxu0  ;;  %v503_v50 = vpop.f32.mrb[4].mxu1 }
 0x132   : > { %765 = vst [vmem:[%s2000_s29 + $0x10] sm:$0xff] %v359_v49  ;;  %789 = vst [vmem:[%s2000_s29 + $0xd0] sm:$0xff] %v503_v50  ;;  %v361_v51 = vpop.f32.mrb[5].mxu0  ;;  %v505_v52 = vpop.f32.mrb[5].mxu1 }
 0x133   : > { %1263 = vst [vmem:[%s2000_s29 + $0x110] sm:$0xff] %v361_v51  ;;  %1287 = vst [vmem:[%s2000_s29 + $0x1d0] sm:$0xff] %v505_v52 }
 0x135   : > { %v365_v53 = vpop.f32.mrb[6].mxu0  ;;  %v509_v54 = vpop.f32.mrb[6].mxu1 }
 0x136   : > { %766 = vst [vmem:[%s2000_s29 + $0x18] sm:$0xff] %v365_v53  ;;  %790 = vst [vmem:[%s2000_s29 + $0xd8] sm:$0xff] %v509_v54  ;;  %v367_v55 = vpop.f32.mrb[7].mxu0  ;;  %v511_v56 = vpop.f32.mrb[7].mxu1 }
 0x137   : > { %1264 = vst [vmem:[%s2000_s29 + $0x118] sm:$0xff] %v367_v55  ;;  %1288 = vst [vmem:[%s2000_s29 + $0x1d8] sm:$0xff] %v511_v56 }
 0x139   : > { %v371_v57 = vpop.f32.mrb[8].mxu0  ;;  %v515_v58 = vpop.f32.mrb[8].mxu1 }
 0x13a   : > { %767 = vst [vmem:[%s2000_s29 + $0x20] sm:$0xff] %v371_v57  ;;  %791 = vst [vmem:[%s2000_s29 + $0xe0] sm:$0xff] %v515_v58  ;;  %v373_v59 = vpop.f32.mrb[9].mxu0  ;;  %v517_v60 = vpop.f32.mrb[9].mxu1 }
 0x13b   : > { %1265 = vst [vmem:[%s2000_s29 + $0x120] sm:$0xff] %v373_v59  ;;  %1289 = vst [vmem:[%s2000_s29 + $0x1e0] sm:$0xff] %v517_v60 }
 0x13d   : > { %v377_v61 = vpop.f32.mrb[10].mxu0  ;;  %v521_v62 = vpop.f32.mrb[10].mxu1 }
 0x13e   : > { %768 = vst [vmem:[%s2000_s29 + $0x28] sm:$0xff] %v377_v61  ;;  %792 = vst [vmem:[%s2000_s29 + $0xe8] sm:$0xff] %v521_v62  ;;  %v379_v63 = vpop.f32.mrb[11].mxu0  ;;  %v523_v1 = vpop.f32.mrb[11].mxu1 }
 0x13f   : > { %1266 = vst [vmem:[%s2000_s29 + $0x128] sm:$0xff] %v379_v63  ;;  %1290 = vst [vmem:[%s2000_s29 + $0x1e8] sm:$0xff] %v523_v1 }
 0x141   : > { %v383_v2 = vpop.f32.mrb[12].mxu0  ;;  %v527_v3 = vpop.f32.mrb[12].mxu1 }
 0x142   : > { %769 = vst [vmem:[%s2000_s29 + $0x30] sm:$0xff] %v383_v2  ;;  %793 = vst [vmem:[%s2000_s29 + $0xf0] sm:$0xff] %v527_v3  ;;  %v385_v4 = vpop.f32.mrb[13].mxu0  ;;  %v529_v5 = vpop.f32.mrb[13].mxu1 }
 0x143   : > { %1267 = vst [vmem:[%s2000_s29 + $0x130] sm:$0xff] %v385_v4  ;;  %1291 = vst [vmem:[%s2000_s29 + $0x1f0] sm:$0xff] %v529_v5 }
 0x145   : > { %v389_v6 = vpop.f32.mrb[14].mxu0  ;;  %v533_v7 = vpop.f32.mrb[14].mxu1 }
 0x146   : > { %770 = vst [vmem:[%s2000_s29 + $0x38] sm:$0xff] %v389_v6  ;;  %794 = vst [vmem:[%s2000_s29 + $0xf8] sm:$0xff] %v533_v7  ;;  %v391_v8 = vpop.f32.mrb[15].mxu0  ;;  %v535_v9 = vpop.f32.mrb[15].mxu1 }
 0x147   : > { %1268 = vst [vmem:[%s2000_s29 + $0x138] sm:$0xff] %v391_v8  ;;  %1292 = vst [vmem:[%s2000_s29 + $0x1f8] sm:$0xff] %v535_v9 }
 0x149   : > { %v395_v10 = vpop.f32.mrb[16].mxu0  ;;  %v1382_v11 = vpop.f32.mrb[16].mxu1 }
 0x14a   : > { %771 = vst [vmem:[%s2000_s29 + $0x40] sm:$0xff] %v395_v10  ;;  %829 = vst [vmem:[%s2038_s8 + $0x8] sm:$0xff] %v1382_v11  ;;  %v397_v12 = vpop.f32.mrb[17].mxu0  ;;  %v604_v13 = vpop.f32.mrb[17].mxu1  ;;  %v1028_v10 = vld [vmem:[%s2000_s29] sm:$0xff] (%p2262_p9)  ;;  %v1030_v11 = vld [vmem:[%s2000_s29 + $0x8] sm:$0xff] (%p2262_p9) }
 0x14b   : > { %1269 = vst [vmem:[%s2000_s29 + $0x140] sm:$0xff] %v397_v12  ;;  %828 = vst [vmem:[%s2038_s8] sm:$0xff] %v604_v13  ;;  %v1032_v12 = vld [vmem:[%s2000_s29 + $0x10] sm:$0xff] (%p2262_p9)  ;;  %v1034_v13 = vld [vmem:[%s2000_s29 + $0x18] sm:$0xff] (%p2262_p9) }
 0x14c   : > { %1029 = vst [vmem:[%s2113_s11] sm:$0xff] (%p2262_p9), %v1028_v10  ;;  %1031 = vst [vmem:[%s2113_s11 + $0x8] sm:$0xff] (%p2262_p9), %v1030_v11 }
 0x14d   : > { %v401_v14 = vpop.f32.mrb[18].mxu0  ;;  %v1385_v15 = vpop.f32.mrb[18].mxu1  ;;  %1033 = vst [vmem:[%s2113_s11 + $0x10] sm:$0xff] (%p2262_p9), %v1032_v12  ;;  %1035 = vst [vmem:[%s2113_s11 + $0x18] sm:$0xff] (%p2262_p9), %v1034_v13 }
 0x14e   : > { %772 = vst [vmem:[%s2000_s29 + $0x48] sm:$0xff] %v401_v14  ;;  %831 = vst [vmem:[%s2038_s8 + $0x18] sm:$0xff] %v1385_v15  ;;  %v403_v16 = vpop.f32.mrb[19].mxu0  ;;  %v614_v17 = vpop.f32.mrb[19].mxu1  ;;  %v1036_v14 = vld [vmem:[%s2000_s29 + $0x20] sm:$0xff] (%p2262_p9)  ;;  %v1038_v15 = vld [vmem:[%s2000_s29 + $0x28] sm:$0xff] (%p2262_p9) }
 0x14f   : > { %1270 = vst [vmem:[%s2000_s29 + $0x148] sm:$0xff] %v403_v16  ;;  %830 = vst [vmem:[%s2038_s8 + $0x10] sm:$0xff] %v614_v17  ;;  %v1040_v16 = vld [vmem:[%s2000_s29 + $0x30] sm:$0xff] (%p2262_p9)  ;;  %v1042_v17 = vld [vmem:[%s2000_s29 + $0x38] sm:$0xff] (%p2262_p9) }
 0x150   : > { %1037 = vst [vmem:[%s2113_s11 + $0x20] sm:$0xff] (%p2262_p9), %v1036_v14  ;;  %1039 = vst [vmem:[%s2113_s11 + $0x28] sm:$0xff] (%p2262_p9), %v1038_v15 }
 0x151   : > { %v407_v18 = vpop.f32.mrb[20].mxu0  ;;  %v1388_v19 = vpop.f32.mrb[20].mxu1  ;;  %1041 = vst [vmem:[%s2113_s11 + $0x30] sm:$0xff] (%p2262_p9), %v1040_v16  ;;  %1043 = vst [vmem:[%s2113_s11 + $0x38] sm:$0xff] (%p2262_p9), %v1042_v17 }
 0x152   : > { %773 = vst [vmem:[%s2000_s29 + $0x50] sm:$0xff] %v407_v18  ;;  %833 = vst [vmem:[%s2038_s8 + $0x28] sm:$0xff] %v1388_v19  ;;  %v409_v20 = vpop.f32.mrb[21].mxu0  ;;  %v624_v21 = vpop.f32.mrb[21].mxu1  ;;  %v1044_v18 = vld [vmem:[%s2000_s29 + $0x40] sm:$0xff] (%p2262_p9) }
 0x153   : > { %1271 = vst [vmem:[%s2000_s29 + $0x150] sm:$0xff] %v409_v20  ;;  %832 = vst [vmem:[%s2038_s8 + $0x20] sm:$0xff] %v624_v21 }
 0x154   : > { %1045 = vst [vmem:[%s2113_s11 + $0x40] sm:$0xff] (%p2262_p9), %v1044_v18 }
 0x155   : > { %v413_v22 = vpop.f32.mrb[22].mxu0  ;;  %v1391_v23 = vpop.f32.mrb[22].mxu1  ;;  %v1046_v19 = vld [vmem:[%s2000_s29 + $0x48] sm:$0xff] (%p2262_p9) }
 0x156   : > { %774 = vst [vmem:[%s2000_s29 + $0x58] sm:$0xff] %v413_v22  ;;  %835 = vst [vmem:[%s2038_s8 + $0x38] sm:$0xff] %v1391_v23  ;;  %v415_v24 = vpop.f32.mrb[23].mxu0  ;;  %v634_v25 = vpop.f32.mrb[23].mxu1 }
 0x157   : > { %1272 = vst [vmem:[%s2000_s29 + $0x158] sm:$0xff] %v415_v24  ;;  %834 = vst [vmem:[%s2038_s8 + $0x30] sm:$0xff] %v634_v25 }
 0x158   : > { %1047 = vst [vmem:[%s2113_s11 + $0x48] sm:$0xff] (%p2262_p9), %v1046_v19 }
 0x159   : > { %v419_v26 = vpop.f32.mrb[24].mxu0  ;;  %v1394_v27 = vpop.f32.mrb[24].mxu1  ;;  %v1048_v20 = vld [vmem:[%s2000_s29 + $0x50] sm:$0xff] (%p2262_p9) }
 0x15a   : > { %775 = vst [vmem:[%s2000_s29 + $0x60] sm:$0xff] %v419_v26  ;;  %837 = vst [vmem:[%s2038_s8 + $0x48] sm:$0xff] %v1394_v27  ;;  %v421_v28 = vpop.f32.mrb[25].mxu0  ;;  %v644_v29 = vpop.f32.mrb[25].mxu1 }
 0x15b   : > { %1273 = vst [vmem:[%s2000_s29 + $0x160] sm:$0xff] %v421_v28  ;;  %836 = vst [vmem:[%s2038_s8 + $0x40] sm:$0xff] %v644_v29 }
 0x15c   : > { %1049 = vst [vmem:[%s2113_s11 + $0x50] sm:$0xff] (%p2262_p9), %v1048_v20 }
 0x15d   : > { %v425_v30 = vpop.f32.mrb[26].mxu0  ;;  %v1397_v31 = vpop.f32.mrb[26].mxu1  ;;  %v1050_v21 = vld [vmem:[%s2000_s29 + $0x58] sm:$0xff] (%p2262_p9) }
 0x15e   : > { %776 = vst [vmem:[%s2000_s29 + $0x68] sm:$0xff] %v425_v30  ;;  %839 = vst [vmem:[%s2038_s8 + $0x58] sm:$0xff] %v1397_v31  ;;  %v427_v32 = vpop.f32.mrb[27].mxu0  ;;  %v654_v33 = vpop.f32.mrb[27].mxu1 }
 0x15f   : > { %1274 = vst [vmem:[%s2000_s29 + $0x168] sm:$0xff] %v427_v32  ;;  %838 = vst [vmem:[%s2038_s8 + $0x50] sm:$0xff] %v654_v33 }
 0x160   : > { %1051 = vst [vmem:[%s2113_s11 + $0x58] sm:$0xff] (%p2262_p9), %v1050_v21 }
 0x161   : > { %v431_v34 = vpop.f32.mrb[28].mxu0  ;;  %v1400_v35 = vpop.f32.mrb[28].mxu1  ;;  %v1052_v22 = vld [vmem:[%s2000_s29 + $0x60] sm:$0xff] (%p2262_p9) }
 0x162   : > { %777 = vst [vmem:[%s2000_s29 + $0x70] sm:$0xff] %v431_v34  ;;  %841 = vst [vmem:[%s2038_s8 + $0x68] sm:$0xff] %v1400_v35  ;;  %v433_v36 = vpop.f32.mrb[29].mxu0  ;;  %v664_v37 = vpop.f32.mrb[29].mxu1  ;;  %v1076_v34 = vld [vmem:[%s2000_s29 + $0xc0] sm:$0xff] (%p2262_p9)  ;;  %v1078_v35 = vld [vmem:[%s2000_s29 + $0xc8] sm:$0xff] (%p2262_p9) }
 0x163   : > { %1275 = vst [vmem:[%s2000_s29 + $0x170] sm:$0xff] %v433_v36  ;;  %840 = vst [vmem:[%s2038_s8 + $0x60] sm:$0xff] %v664_v37  ;;  %v1080_v36 = vld [vmem:[%s2000_s29 + $0xd0] sm:$0xff] (%p2262_p9)  ;;  %v1082_v37 = vld [vmem:[%s2000_s29 + $0xd8] sm:$0xff] (%p2262_p9) }
 0x164   : > { %1053 = vst [vmem:[%s2113_s11 + $0x60] sm:$0xff] (%p2262_p9), %v1052_v22  ;;  %1077 = vst [vmem:[%s2113_s11 + $0xc0] sm:$0xff] (%p2262_p9), %v1076_v34 }
 0x165   : > { %v437_v38 = vpop.f32.mrb[30].mxu0  ;;  %v1403_v39 = vpop.f32.mrb[30].mxu1  ;;  %v1054_v23 = vld [vmem:[%s2000_s29 + $0x68] sm:$0xff] (%p2262_p9)  ;;  %1079 = vst [vmem:[%s2113_s11 + $0xc8] sm:$0xff] (%p2262_p9), %v1078_v35  ;;  %1081 = vst [vmem:[%s2113_s11 + $0xd0] sm:$0xff] (%p2262_p9), %v1080_v36 }
 0x166   : > { %778 = vst [vmem:[%s2000_s29 + $0x78] sm:$0xff] %v437_v38  ;;  %843 = vst [vmem:[%s2038_s8 + $0x78] sm:$0xff] %v1403_v39  ;;  %v439_v40 = vpop.f32.mrb[31].mxu0  ;;  %v674_v41 = vpop.f32.mrb[31].mxu1  ;;  %v1084_v38 = vld [vmem:[%s2000_s29 + $0xe0] sm:$0xff] (%p2262_p9)  ;;  %v1086_v39 = vld [vmem:[%s2000_s29 + $0xe8] sm:$0xff] (%p2262_p9) }
 0x167   : > { %1276 = vst [vmem:[%s2000_s29 + $0x178] sm:$0xff] %v439_v40  ;;  %842 = vst [vmem:[%s2038_s8 + $0x70] sm:$0xff] %v674_v41  ;;  %v1088_v40 = vld [vmem:[%s2000_s29 + $0xf0] sm:$0xff] (%p2262_p9)  ;;  %v1090_v41 = vld [vmem:[%s2000_s29 + $0xf8] sm:$0xff] (%p2262_p9) }
 0x168   : > { %1055 = vst [vmem:[%s2113_s11 + $0x68] sm:$0xff] (%p2262_p9), %v1054_v23  ;;  %1083 = vst [vmem:[%s2113_s11 + $0xd8] sm:$0xff] (%p2262_p9), %v1082_v37 }
 0x169   : > { %v443_v42 = vpop.f32.mrb[32].mxu0  ;;  %v1406_v43 = vpop.f32.mrb[32].mxu1  ;;  %v1056_v24 = vld [vmem:[%s2000_s29 + $0x70] sm:$0xff] (%p2262_p9)  ;;  %1085 = vst [vmem:[%s2113_s11 + $0xe0] sm:$0xff] (%p2262_p9), %v1084_v38  ;;  %1087 = vst [vmem:[%s2113_s11 + $0xe8] sm:$0xff] (%p2262_p9), %v1086_v39 }
 0x16a   : > { %779 = vst [vmem:[%s2000_s29 + $0x80] sm:$0xff] %v443_v42  ;;  %845 = vst [vmem:[%s2038_s8 + $0x88] sm:$0xff] %v1406_v43  ;;  %v445_v0 = vpop.f32.mrb[33].mxu0  ;;  %v684_v44 = vpop.f32.mrb[33].mxu1  ;;  %v1092_v42 = vld [vmem:[%s2000_s29 + $0x100] sm:$0xff] (%p2262_p9)  ;;  %v1094_v43 = vld [vmem:[%s2000_s29 + $0x108] sm:$0xff] (%p2262_p9) }
 0x16b   : > { %1277 = vst [vmem:[%s2000_s29 + $0x180] sm:$0xff] %v445_v0  ;;  %844 = vst [vmem:[%s2038_s8 + $0x80] sm:$0xff] %v684_v44  ;;  %v1096_v0 = vld [vmem:[%s2000_s29 + $0x110] sm:$0xff] (%p2262_p9)  ;;  %v1098_v44 = vld [vmem:[%s2000_s29 + $0x118] sm:$0xff] (%p2262_p9) }
 0x16c   : > { %1057 = vst [vmem:[%s2113_s11 + $0x70] sm:$0xff] (%p2262_p9), %v1056_v24  ;;  %1089 = vst [vmem:[%s2113_s11 + $0xf0] sm:$0xff] (%p2262_p9), %v1088_v40 }
 0x16d   : > { %v449_v45 = vpop.f32.mrb[34].mxu0  ;;  %v1409_v46 = vpop.f32.mrb[34].mxu1  ;;  %v1058_v25 = vld [vmem:[%s2000_s29 + $0x78] sm:$0xff] (%p2262_p9)  ;;  %1091 = vst [vmem:[%s2113_s11 + $0xf8] sm:$0xff] (%p2262_p9), %v1090_v41  ;;  %1093 = vst [vmem:[%s2113_s11 + $0x200] sm:$0xff] (%p2262_p9), %v1092_v42 }
 0x16e   : > { %780 = vst [vmem:[%s2000_s29 + $0x88] sm:$0xff] %v449_v45  ;;  %847 = vst [vmem:[%s2038_s8 + $0x98] sm:$0xff] %v1409_v46  ;;  %v451_v47 = vpop.f32.mrb[35].mxu0  ;;  %v694_v48 = vpop.f32.mrb[35].mxu1  ;;  %v1100_v45 = vld [vmem:[%s2000_s29 + $0x120] sm:$0xff] (%p2262_p9)  ;;  %v1102_v46 = vld [vmem:[%s2000_s29 + $0x128] sm:$0xff] (%p2262_p9) }
 0x16f   : > { %1278 = vst [vmem:[%s2000_s29 + $0x188] sm:$0xff] %v451_v47  ;;  %846 = vst [vmem:[%s2038_s8 + $0x90] sm:$0xff] %v694_v48  ;;  %v1104_v47 = vld [vmem:[%s2000_s29 + $0x130] sm:$0xff] (%p2262_p9)  ;;  %v1106_v48 = vld [vmem:[%s2000_s29 + $0x138] sm:$0xff] (%p2262_p9) }
 0x170   : > { %1059 = vst [vmem:[%s2113_s11 + $0x78] sm:$0xff] (%p2262_p9), %v1058_v25  ;;  %1095 = vst [vmem:[%s2113_s11 + $0x208] sm:$0xff] (%p2262_p9), %v1094_v43 }
 0x171   : > { %v455_v49 = vpop.f32.mrb[36].mxu0  ;;  %v1412_v50 = vpop.f32.mrb[36].mxu1  ;;  %v1060_v26 = vld [vmem:[%s2000_s29 + $0x80] sm:$0xff] (%p2262_p9)  ;;  %1097 = vst [vmem:[%s2113_s11 + $0x210] sm:$0xff] (%p2262_p9), %v1096_v0  ;;  %1099 = vst [vmem:[%s2113_s11 + $0x218] sm:$0xff] (%p2262_p9), %v1098_v44 }
 0x172   : > { %781 = vst [vmem:[%s2000_s29 + $0x90] sm:$0xff] %v455_v49  ;;  %849 = vst [vmem:[%s2038_s8 + $0xa8] sm:$0xff] %v1412_v50  ;;  %v457_v51 = vpop.f32.mrb[37].mxu0  ;;  %v704_v52 = vpop.f32.mrb[37].mxu1  ;;  %v1108_v49 = vld [vmem:[%s2000_s29 + $0x140] sm:$0xff] (%p2262_p9)  ;;  %v1110_v50 = vld [vmem:[%s2000_s29 + $0x148] sm:$0xff] (%p2262_p9) }
 0x173   : > { %1279 = vst [vmem:[%s2000_s29 + $0x190] sm:$0xff] %v457_v51  ;;  %848 = vst [vmem:[%s2038_s8 + $0xa0] sm:$0xff] %v704_v52  ;;  %v1112_v51 = vld [vmem:[%s2000_s29 + $0x150] sm:$0xff] (%p2262_p9)  ;;  %v1114_v52 = vld [vmem:[%s2000_s29 + $0x158] sm:$0xff] (%p2262_p9) }
 0x174   : > { %1061 = vst [vmem:[%s2113_s11 + $0x80] sm:$0xff] (%p2262_p9), %v1060_v26  ;;  %1101 = vst [vmem:[%s2113_s11 + $0x220] sm:$0xff] (%p2262_p9), %v1100_v45 }
 0x175   : > { %v461_v53 = vpop.f32.mrb[38].mxu0  ;;  %v1415_v54 = vpop.f32.mrb[38].mxu1  ;;  %v1062_v27 = vld [vmem:[%s2000_s29 + $0x88] sm:$0xff] (%p2262_p9)  ;;  %1103 = vst [vmem:[%s2113_s11 + $0x228] sm:$0xff] (%p2262_p9), %v1102_v46  ;;  %1105 = vst [vmem:[%s2113_s11 + $0x230] sm:$0xff] (%p2262_p9), %v1104_v47 }
 0x176   : > { %782 = vst [vmem:[%s2000_s29 + $0x98] sm:$0xff] %v461_v53  ;;  %851 = vst [vmem:[%s2038_s8 + $0xb8] sm:$0xff] %v1415_v54  ;;  %v463_v55 = vpop.f32.mrb[39].mxu0  ;;  %v714_v56 = vpop.f32.mrb[39].mxu1  ;;  %v1116_v53 = vld [vmem:[%s2000_s29 + $0x160] sm:$0xff] (%p2262_p9)  ;;  %v1118_v54 = vld [vmem:[%s2000_s29 + $0x168] sm:$0xff] (%p2262_p9) }
 0x177   : > { %1280 = vst [vmem:[%s2000_s29 + $0x198] sm:$0xff] %v463_v55  ;;  %850 = vst [vmem:[%s2038_s8 + $0xb0] sm:$0xff] %v714_v56  ;;  %v1120_v55 = vld [vmem:[%s2000_s29 + $0x170] sm:$0xff] (%p2262_p9)  ;;  %v1122_v56 = vld [vmem:[%s2000_s29 + $0x178] sm:$0xff] (%p2262_p9) }
 0x178   : > { %1063 = vst [vmem:[%s2113_s11 + $0x88] sm:$0xff] (%p2262_p9), %v1062_v27  ;;  %1107 = vst [vmem:[%s2113_s11 + $0x238] sm:$0xff] (%p2262_p9), %v1106_v48 }
 0x179   : > { %v467_v57 = vpop.f32.mrb[40].mxu0  ;;  %v1418_v58 = vpop.f32.mrb[40].mxu1  ;;  %v1064_v28 = vld [vmem:[%s2000_s29 + $0x90] sm:$0xff] (%p2262_p9)  ;;  %1109 = vst [vmem:[%s2113_s11 + $0x240] sm:$0xff] (%p2262_p9), %v1108_v49  ;;  %1111 = vst [vmem:[%s2113_s11 + $0x248] sm:$0xff] (%p2262_p9), %v1110_v50 }
 0x17a   : > { %783 = vst [vmem:[%s2000_s29 + $0xa0] sm:$0xff] %v467_v57  ;;  %853 = vst [vmem:[%s2038_s8 + $0xc8] sm:$0xff] %v1418_v58  ;;  %v469_v59 = vpop.f32.mrb[41].mxu0  ;;  %v724_v60 = vpop.f32.mrb[41].mxu1  ;;  %v1124_v57 = vld [vmem:[%s2000_s29 + $0x180] sm:$0xff] (%p2262_p9)  ;;  %v1126_v58 = vld [vmem:[%s2000_s29 + $0x188] sm:$0xff] (%p2262_p9) }
 0x17b   : > { %1281 = vst [vmem:[%s2000_s29 + $0x1a0] sm:$0xff] %v469_v59  ;;  %852 = vst [vmem:[%s2038_s8 + $0xc0] sm:$0xff] %v724_v60  ;;  %v1128_v59 = vld [vmem:[%s2000_s29 + $0x190] sm:$0xff] (%p2262_p9) }
 0x17c   : > { %1065 = vst [vmem:[%s2113_s11 + $0x90] sm:$0xff] (%p2262_p9), %v1064_v28  ;;  %1113 = vst [vmem:[%s2113_s11 + $0x250] sm:$0xff] (%p2262_p9), %v1112_v51 }
 0x17d   : > { %v473_v61 = vpop.f32.mrb[42].mxu0  ;;  %v1421_v62 = vpop.f32.mrb[42].mxu1  ;;  %v1066_v29 = vld [vmem:[%s2000_s29 + $0x98] sm:$0xff] (%p2262_p9)  ;;  %1115 = vst [vmem:[%s2113_s11 + $0x258] sm:$0xff] (%p2262_p9), %v1114_v52  ;;  %1117 = vst [vmem:[%s2113_s11 + $0x260] sm:$0xff] (%p2262_p9), %v1116_v53 }
 0x17e   : > { %784 = vst [vmem:[%s2000_s29 + $0xa8] sm:$0xff] %v473_v61  ;;  %855 = vst [vmem:[%s2038_s8 + $0xd8] sm:$0xff] %v1421_v62  ;;  %v475_v63 = vpop.f32.mrb[43].mxu0  ;;  %v734_v1 = vpop.f32.mrb[43].mxu1  ;;  %v1130_v60 = vld [vmem:[%s2000_s29 + $0x198] sm:$0xff] (%p2262_p9) }
 0x17f   : > { %1282 = vst [vmem:[%s2000_s29 + $0x1a8] sm:$0xff] %v475_v63  ;;  %854 = vst [vmem:[%s2038_s8 + $0xd0] sm:$0xff] %v734_v1 }
 0x180   : > { %1067 = vst [vmem:[%s2113_s11 + $0x98] sm:$0xff] (%p2262_p9), %v1066_v29  ;;  %1119 = vst [vmem:[%s2113_s11 + $0x268] sm:$0xff] (%p2262_p9), %v1118_v54 }
 0x181   : > { %v479_v2 = vpop.f32.mrb[44].mxu0  ;;  %v1424_v3 = vpop.f32.mrb[44].mxu1  ;;  %871 = sbr.rel (!%p2262_p9) target bundleno = 400 (0x190), region = 36  ;;  %v1068_v30 = vld [vmem:[%s2000_s29 + $0xa0] sm:$0xff] (%p2262_p9)  ;;  %1121 = vst [vmem:[%s2113_s11 + $0x270] sm:$0xff] (%p2262_p9), %v1120_v55  ;;  %1123 = vst [vmem:[%s2113_s11 + $0x278] sm:$0xff] (%p2262_p9), %v1122_v56 }
 0x182   : > { %785 = vst [vmem:[%s2000_s29 + $0xb0] sm:$0xff] %v479_v2  ;;  %857 = vst [vmem:[%s2038_s8 + $0xe8] sm:$0xff] %v1424_v3  ;;  %v481_v4 = vpop.f32.mrb[45].mxu0  ;;  %v744_v5 = vpop.f32.mrb[45].mxu1  ;;  %v1132_v61 = vld [vmem:[%s2000_s29 + $0x1a0] sm:$0xff] (%p2262_p9)  ;;  %v1142_v3 = vld [vmem:[%s2000_s29 + $0x1c8] sm:$0xff] (%p2262_p9) }
 0x183   : > { %1283 = vst [vmem:[%s2000_s29 + $0x1b0] sm:$0xff] %v481_v4  ;;  %856 = vst [vmem:[%s2038_s8 + $0xe0] sm:$0xff] %v744_v5  ;;  %v1140_v2 = vld [vmem:[%s2000_s29 + $0x1c0] sm:$0xff] (%p2262_p9)  ;;  %v1144_v4 = vld [vmem:[%s2000_s29 + $0x1d0] sm:$0xff] (%p2262_p9) }
 0x184   : > { %1069 = vst [vmem:[%s2113_s11 + $0xa0] sm:$0xff] (%p2262_p9), %v1068_v30  ;;  %1125 = vst [vmem:[%s2113_s11 + $0x280] sm:$0xff] (%p2262_p9), %v1124_v57  ;;  %v1146_v5 = vld [vmem:[%s2000_s29 + $0x1d8] sm:$0xff] (%p2262_p9) }
 0x185   : > { %v485_v6 = vpop.f32.mrb[46].mxu0  ;;  %v1427_v7 = vpop.f32.mrb[46].mxu1  ;;  %v1070_v31 = vld [vmem:[%s2000_s29 + $0xa8] sm:$0xff] (%p2262_p9)  ;;  %1127 = vst [vmem:[%s2113_s11 + $0x288] sm:$0xff] (%p2262_p9), %v1126_v58  ;;  %1129 = vst [vmem:[%s2113_s11 + $0x290] sm:$0xff] (%p2262_p9), %v1128_v59 }
 0x186   : > { %786 = vst [vmem:[%s2000_s29 + $0xb8] sm:$0xff] %v485_v6  ;;  %859 = vst [vmem:[%s2038_s8 + $0xf8] sm:$0xff] %v1427_v7  ;;  %v487_v8 = vpop.f32.mrb[47].mxu0  ;;  %v754_v9 = vpop.f32.mrb[47].mxu1  ;;  %v1134_v62 = vld [vmem:[%s2000_s29 + $0x1a8] sm:$0xff] (%p2262_p9)  ;;  %v1148_v6 = vld [vmem:[%s2000_s29 + $0x1e0] sm:$0xff] (%p2262_p9) }
 0x187   : > { %1284 = vst [vmem:[%s2000_s29 + $0x1b8] sm:$0xff] %v487_v8  ;;  %858 = vst [vmem:[%s2038_s8 + $0xf0] sm:$0xff] %v754_v9  ;;  %v1150_v7 = vld [vmem:[%s2000_s29 + $0x1e8] sm:$0xff] (%p2262_p9)  ;;  %v1152_v8 = vld [vmem:[%s2000_s29 + $0x1f0] sm:$0xff] (%p2262_p9) }
 0x188   : > { %1071 = vst [vmem:[%s2113_s11 + $0xa8] sm:$0xff] %v1070_v31  ;;  %1131 = vst [vmem:[%s2113_s11 + $0x298] sm:$0xff] %v1130_v60  ;;  %v1154_v9 = vld [vmem:[%s2000_s29 + $0x1f8] sm:$0xff] }
 0x189   : > { %v1072_v32 = vld [vmem:[%s2000_s29 + $0xb0] sm:$0xff]  ;;  %1133 = vst [vmem:[%s2113_s11 + $0x2a0] sm:$0xff] %v1132_v61  ;;  %1135 = vst [vmem:[%s2113_s11 + $0x2a8] sm:$0xff] %v1134_v62 }
 0x18a   : > { %1073 = vst [vmem:[%s2113_s11 + $0xb0] sm:$0xff] %v1072_v32  ;;  %v1136_v63 = vld [vmem:[%s2000_s29 + $0x1b0] sm:$0xff]  ;;  %1141 = vst [vmem:[%s2113_s11 + $0x2c0] sm:$0xff] %v1140_v2 }
 0x18b   : > { %1137 = vst [vmem:[%s2113_s11 + $0x2b0] sm:$0xff] %v1136_v63  ;;  %1143 = vst [vmem:[%s2113_s11 + $0x2c8] sm:$0xff] %v1142_v3 }
 0x18c   : > { %1145 = vst [vmem:[%s2113_s11 + $0x2d0] sm:$0xff] %v1144_v4  ;;  %1147 = vst [vmem:[%s2113_s11 + $0x2d8] sm:$0xff] %v1146_v5 }
 0x18d   : > { %v1074_v33 = vld [vmem:[%s2000_s29 + $0xb8] sm:$0xff]  ;;  %1149 = vst [vmem:[%s2113_s11 + $0x2e0] sm:$0xff] %v1148_v6  ;;  %1151 = vst [vmem:[%s2113_s11 + $0x2e8] sm:$0xff] %v1150_v7 }
 0x18e   : > { %1075 = vst [vmem:[%s2113_s11 + $0xb8] sm:$0xff] %v1074_v33  ;;  %v1138_v1 = vld [vmem:[%s2000_s29 + $0x1b8] sm:$0xff]  ;;  %1153 = vst [vmem:[%s2113_s11 + $0x2f0] sm:$0xff] %v1152_v8 }
 0x18f   : > { %1139 = vst [vmem:[%s2113_s11 + $0x2b8] sm:$0xff] %v1138_v1  ;;  %1155 = vst [vmem:[%s2113_s11 + $0x2f8] sm:$0xff] %v1154_v9 }
 0x190 PF: > { %p14_p10 = scmp.ge.s32.totalorder %s1662_s17, 4   ;;  %s2263_s12 = smov %s1606_s13 }
 0x191   : > { %s2264_s13 = smov %s1610_s14  ;;  %s2265_s14 = smov %s1672_s20 }
 0x192   : > { %s2266_s15 = smov %s1662_s17  ;;  %16 = sbr.rel (!%p14_p10) target bundleno = 3 (0x3), region = 119 }
 0x199   :  { %1183 = vsyncpa [#allocation3], 1 }
 0x19a   :  { %1185 = vsyncpa [#allocation3 + $0x1], 1 }

</bundles_post_ra>
